<compile_context>
chip_gen: v5e
topology: v5e:2x2
jax: 0.10.0
libtpu: 0.0.40
codegen_flags: <defaults>
</compile_context>

<pallas_src>
import jax
import jax.numpy as jnp
from jax.experimental import pallas as pl
from jax.experimental.pallas import tpu as pltpu


# ----------------------------- Pallas kernels ------------------------------

def _conv_tanh_pool_kernel(w_ref, b_ref, col_ref, out_ref):
    # w:(C_out,K)  b:(C_out,1)  col:(K, 4*L)  out:(C_out, L)   with L = N*P
    # Lane layout of col / y: quadrant-major, then batch, then pooled position.
    y = jnp.dot(w_ref[...], col_ref[...], preferred_element_type=jnp.float32)
    L = out_ref.shape[1]
    m = jnp.maximum(jnp.maximum(y[:, 0 * L:1 * L], y[:, 1 * L:2 * L]),
                    jnp.maximum(y[:, 2 * L:3 * L], y[:, 3 * L:4 * L]))
    out_ref[...] = jnp.tanh(m + b_ref[...]).astype(out_ref.dtype)


def _conv2_mlp_kernel(w2_ref, b2_ref, col_ref, fw1_ref, fb1_ref,
                      fw2_ref, fb2_ref, out_ref):
    # w2:(C2,K2) b2:(C2,1) col:(K2, 4*N*P2) fw1:(H, C2, P2) fb1:(H,1)
    # fw2:(O,H)  fb2:(O,1) out:(O,N)
    n_batch = out_ref.shape[1]
    p2 = fw1_ref.shape[2]
    L = n_batch * p2

    # conv2 as one MXU matmul, then pool-max over 4 lane chunks, then bias+tanh.
    y = jnp.dot(w2_ref[...], col_ref[...], preferred_element_type=jnp.float32)
    m = jnp.maximum(jnp.maximum(y[:, 0 * L:1 * L], y[:, 1 * L:2 * L]),
                    jnp.maximum(y[:, 2 * L:3 * L], y[:, 3 * L:4 * L]))
    h2 = jnp.tanh(m + b2_ref[...])                       # (C2, N*P2), lane = n*P2 + pos

    # Fused flatten + fc1 + tanh + fc2, per batch element (N is static & tiny).
    # fc1 weights arrive pre-reshaped to (H, C2, P2) so the (c, pos) contraction
    # is a broadcast multiply + reductions (no in-kernel reshape/transpose).
    fw1 = fw1_ref[...]                                   # (H, C2, P2)
    fw2 = fw2_ref[...]                                   # (O, H)
    for n in range(n_batch):
        xn = h2[:, n * p2:(n + 1) * p2]                  # (C2, P2)
        s = jnp.sum(fw1 * xn[None, :, :], axis=2)        # (H, C2)
        hp = jnp.sum(s, axis=1, keepdims=True)           # (H, 1)
        hn = jnp.tanh(hp + fb1_ref[...])                 # (H, 1)
        logit = jnp.dot(fw2, hn, preferred_element_type=jnp.float32) + fb2_ref[...]
        out_ref[:, n:n + 1] = logit.astype(out_ref.dtype)


# ------------------------------- glue (JAX) --------------------------------

def _im2col_quadrant_cols(x_nchw, ksize=3, pad=1):
    """(N,C,H,W) -> (C*k*k, 4*N*(H//2)*(W//2)).

    Lane order: quadrant-major, then batch, then pooled position (row-major),
    so the kernel pools with 3 maxes over 128-aligned lane chunks.
    k-index = cin*9 + dy*3 + dx  (matches OIHW weight reshape (C_out, C_in*9)).
    """
    n, c, h, w = x_nchw.shape
    k = c * ksize * ksize
    p = (h // 2) * (w // 2)
    xp = jnp.pad(x_nchw, ((0, 0), (0, 0), (pad, pad), (pad, pad)))
    shifts = [xp[:, :, dy:dy + h, dx:dx + w]
              for dy in range(ksize) for dx in range(ksize)]
    patches = jnp.stack(shifts, axis=2).reshape(n, k, h, w)
    quads = [patches[:, :, s0::2, s1::2].reshape(n, k, p)
             for s0 in (0, 1) for s1 in (0, 1)]
    cols = jnp.stack(quads, axis=0)          # (4, N, K, P)
    cols = cols.transpose(2, 0, 1, 3)        # (K, 4, N, P)
    return cols.reshape(k, 4 * n * p)


def _vmem_spec():
    return pl.BlockSpec(memory_space=pltpu.MemorySpace.VMEM)


def _conv1_tanh_pool(x_nchw, w_oihw, b):
    n, c, h, w = x_nchw.shape
    c_out = w_oihw.shape[0]
    k = c * 9
    p = (h // 2) * (w // 2)
    cols = _im2col_quadrant_cols(x_nchw)                         # (K, 4*N*P)
    w2d = w_oihw.reshape(c_out, k).astype(jnp.float32)
    b2d = b.reshape(c_out, 1).astype(jnp.float32)
    out = pl.pallas_call(
        _conv_tanh_pool_kernel,
        out_shape=jax.ShapeDtypeStruct((c_out, n * p), jnp.float32),
        in_specs=[_vmem_spec(), _vmem_spec(), _vmem_spec()],
        out_specs=_vmem_spec(),
    )(w2d, b2d, cols)
    # (C_out, N*P) lane = batch*P + pooled pos  ->  (N, C_out, H//2, W//2)
    return out.reshape(c_out, n, h // 2, w // 2).transpose(1, 0, 2, 3)


def netwidth_forward(x, params):
    w1, b1, w2, b2, fw1, fb1, fw2, fb2 = params
    n = x.shape[0]
    c1 = w1.shape[0]                # n_chans
    c2 = w2.shape[0]                # n_chans // 2
    h1 = x.shape[2] // 2            # 16
    p2 = (h1 // 2) * (h1 // 2)      # 64

    # Stage 1: conv1 -> tanh -> maxpool2  (one pallas_call, no batch grid)
    out1 = _conv1_tanh_pool(x, w1, b1)                           # (N, C1, 16, 16)

    # Stage 2 (fused): conv2 -> tanh -> maxpool2 -> flatten -> fc1 -> tanh -> fc2
    cols2 = _im2col_quadrant_cols(out1)                          # (C1*9, 4*N*64)
    w2d = w2.reshape(c2, c1 * 9).astype(jnp.float32)
    b2d = b2.reshape(c2, 1).astype(jnp.float32)
    fw1r = fw1.reshape(fw1.shape[0], c2, p2).astype(jnp.float32)  # (32, C2, 64)
    fb1c = fb1.reshape(-1, 1).astype(jnp.float32)
    fw2m = fw2.astype(jnp.float32)                               # (2, 32)
    fb2c = fb2.reshape(-1, 1).astype(jnp.float32)

    logits_t = pl.pallas_call(
        _conv2_mlp_kernel,
        out_shape=jax.ShapeDtypeStruct((fw2.shape[0], n), jnp.float32),
        in_specs=[_vmem_spec() for _ in range(7)],
        out_specs=_vmem_spec(),
    )(w2d, b2d, cols2, fw1r, fb1c, fw2m, fb2c)
    return logits_t.T                                            # (N, 2)


# --------------------------- params & reference ----------------------------

def init_params(key, n_chans=32):
    ks = jax.random.split(key, 8)

    def u(k, shape, fan_in):
        bound = 1.0 / (fan_in ** 0.5)
        return jax.random.uniform(k, shape, jnp.float32, -bound, bound)

    c2 = n_chans // 2
    w1 = u(ks[0], (n_chans, 3, 3, 3), 3 * 9)
    b1 = u(ks[1], (n_chans,), 3 * 9)
    w2 = u(ks[2], (c2, n_chans, 3, 3), n_chans * 9)
    b2 = u(ks[3], (c2,), n_chans * 9)
    fw1 = u(ks[4], (32, 8 * 8 * c2), 8 * 8 * c2)
    fb1 = u(ks[5], (32,), 8 * 8 * c2)
    fw2 = u(ks[6], (2, 32), 32)
    fb2 = u(ks[7], (2,), 32)
    return (w1, b1, w2, b2, fw1, fb1, fw2, fb2)


def reference_forward(x, params):
    w1, b1, w2, b2, fw1, fb1, fw2, fb2 = params

    def conv(x, w, b):
        y = jax.lax.conv_general_dilated(
            x, w, window_strides=(1, 1), padding=((1, 1), (1, 1)),
            dimension_numbers=("NCHW", "OIHW", "NCHW"))
        return y + b[None, :, None, None]

    def pool(x):
        return jax.lax.reduce_window(x, -jnp.inf, jax.lax.max,
                                     (1, 1, 2, 2), (1, 1, 2, 2), "VALID")

    o = pool(jnp.tanh(conv(x, w1, b1)))
    o = pool(jnp.tanh(conv(o, w2, b2)))
    o = o.reshape(o.shape[0], -1)
    o = jnp.tanh(o @ fw1.T + fb1)
    return o @ fw2.T + fb2


# ---------------------------------- main ------------------------------------

if __name__ == "__main__":
    key = jax.random.PRNGKey(0)
    kx, kp = jax.random.split(key)
    params = init_params(kp, n_chans=32)
    x = jax.random.normal(kx, (2, 3, 32, 32), jnp.float32)   # batch=2, NCHW

    fwd = jax.jit(netwidth_forward)
    out = jax.block_until_ready(fwd(x, params))
    assert out.shape == (2, 2), out.shape

    ref = jax.block_until_ready(reference_forward(x, params))
    assert jnp.allclose(out, ref, rtol=1e-4, atol=1e-4), (
        float(jnp.max(jnp.abs(out - ref))))

    print("KERNEL_OK")
</pallas_src>

<mosaic_0001>
module attributes {stable_mosaic.version = 11 : i64} {
  func.func @_conv_tanh_pool_kernel(%arg0: memref<32x27xf32, #tpu.memory_space<vmem>>, %arg1: memref<32x1xf32, #tpu.memory_space<vmem>>, %arg2: memref<27x2048xf32, #tpu.memory_space<vmem>>, %arg3: memref<32x512xf32, #tpu.memory_space<vmem>>) attributes {dimension_semantics = [], scalar_prefetch = 0 : i64, scratch_operands = 0 : i64, tpu.core_type = #tpu.core_type<tc>} {
    %c0 = arith.constant 0 : index
    %c0_0 = arith.constant 0 : index
    %0 = vector.load %arg0[%c0, %c0_0] : memref<32x27xf32, #tpu.memory_space<vmem>>, vector<32x27xf32>
    %c0_1 = arith.constant 0 : index
    %c0_2 = arith.constant 0 : index
    %1 = vector.load %arg2[%c0_1, %c0_2] : memref<27x2048xf32, #tpu.memory_space<vmem>>, vector<27x2048xf32>
    %cst = arith.constant dense<0.000000e+00> : vector<32x2048xf32>
    %2 = tpu.matmul %0, %1, %cst {dimension_numbers = #tpu.dot_dimension_numbers<[1], [0], [0], [1], [0, 0, 1, 1], [], []>} : vector<32x27xf32>, vector<27x2048xf32>, vector<32x2048xf32> -> vector<32x2048xf32>
    %3 = vector.extract_strided_slice %2 {offsets = [0, 0], sizes = [32, 512], strides = [1, 1]} : vector<32x2048xf32> to vector<32x512xf32>
    %4 = vector.extract_strided_slice %2 {offsets = [0, 512], sizes = [32, 512], strides = [1, 1]} : vector<32x2048xf32> to vector<32x512xf32>
    %5 = arith.maximumf %3, %4 : vector<32x512xf32>
    %6 = vector.extract_strided_slice %2 {offsets = [0, 1024], sizes = [32, 512], strides = [1, 1]} : vector<32x2048xf32> to vector<32x512xf32>
    %7 = vector.extract_strided_slice %2 {offsets = [0, 1536], sizes = [32, 512], strides = [1, 1]} : vector<32x2048xf32> to vector<32x512xf32>
    %8 = arith.maximumf %6, %7 : vector<32x512xf32>
    %9 = arith.maximumf %5, %8 : vector<32x512xf32>
    %c0_3 = arith.constant 0 : index
    %c0_4 = arith.constant 0 : index
    %10 = vector.load %arg1[%c0_3, %c0_4] : memref<32x1xf32, #tpu.memory_space<vmem>>, vector<32x1xf32>
    %11 = vector.broadcast %10 : vector<32x1xf32> to vector<32x512xf32>
    %12 = arith.addf %9, %11 : vector<32x512xf32>
    %13 = math.tanh %12 : vector<32x512xf32>
    %c0_5 = arith.constant 0 : index
    %c0_6 = arith.constant 0 : index
    %14 = vector.load %arg3[%c0_5, %c0_6] : memref<32x512xf32, #tpu.memory_space<vmem>>, vector<32x512xf32>
    tpu.vector_store %arg3[%c0_5, %c0_6], %13 {strides = array<i32>} : memref<32x512xf32, #tpu.memory_space<vmem>>, vector<32x512xf32>,
    return
  }
}

module attributes {stable_mosaic.version = 11 : i64} {
  func.func @_conv2_mlp_kernel(%arg0: memref<16x288xf32, #tpu.memory_space<vmem>>, %arg1: memref<16x1xf32, #tpu.memory_space<vmem>>, %arg2: memref<288x512xf32, #tpu.memory_space<vmem>>, %arg3: memref<32x16x64xf32, #tpu.memory_space<vmem>>, %arg4: memref<32x1xf32, #tpu.memory_space<vmem>>, %arg5: memref<2x32xf32, #tpu.memory_space<vmem>>, %arg6: memref<2x1xf32, #tpu.memory_space<vmem>>, %arg7: memref<2x2xf32, #tpu.memory_space<vmem>>) attributes {dimension_semantics = [], scalar_prefetch = 0 : i64, scratch_operands = 0 : i64, tpu.core_type = #tpu.core_type<tc>} {
    %c0 = arith.constant 0 : index
    %c0_0 = arith.constant 0 : index
    %0 = vector.load %arg0[%c0, %c0_0] : memref<16x288xf32, #tpu.memory_space<vmem>>, vector<16x288xf32>
    %c0_1 = arith.constant 0 : index
    %c0_2 = arith.constant 0 : index
    %1 = vector.load %arg2[%c0_1, %c0_2] : memref<288x512xf32, #tpu.memory_space<vmem>>, vector<288x512xf32>
    %cst = arith.constant dense<0.000000e+00> : vector<16x512xf32>
    %2 = tpu.matmul %0, %1, %cst {dimension_numbers = #tpu.dot_dimension_numbers<[1], [0], [0], [1], [0, 0, 1, 1], [], []>} : vector<16x288xf32>, vector<288x512xf32>, vector<16x512xf32> -> vector<16x512xf32>
    %3 = vector.extract_strided_slice %2 {offsets = [0, 0], sizes = [16, 128], strides = [1, 1]} : vector<16x512xf32> to vector<16x128xf32>
    %4 = vector.extract_strided_slice %2 {offsets = [0, 128], sizes = [16, 128], strides = [1, 1]} : vector<16x512xf32> to vector<16x128xf32>
    %5 = arith.maximumf %3, %4 : vector<16x128xf32>
    %6 = vector.extract_strided_slice %2 {offsets = [0, 256], sizes = [16, 128], strides = [1, 1]} : vector<16x512xf32> to vector<16x128xf32>
    %7 = vector.extract_strided_slice %2 {offsets = [0, 384], sizes = [16, 128], strides = [1, 1]} : vector<16x512xf32> to vector<16x128xf32>
    %8 = arith.maximumf %6, %7 : vector<16x128xf32>
    %9 = arith.maximumf %5, %8 : vector<16x128xf32>
    %c0_3 = arith.constant 0 : index
    %c0_4 = arith.constant 0 : index
    %10 = vector.load %arg1[%c0_3, %c0_4] : memref<16x1xf32, #tpu.memory_space<vmem>>, vector<16x1xf32>
    %11 = vector.broadcast %10 : vector<16x1xf32> to vector<16x128xf32>
    %12 = arith.addf %9, %11 : vector<16x128xf32>
    %13 = math.tanh %12 : vector<16x128xf32>
    %c0_5 = arith.constant 0 : index
    %c0_6 = arith.constant 0 : index
    %c0_7 = arith.constant 0 : index
    %14 = vector.load %arg3[%c0_5, %c0_6, %c0_7] : memref<32x16x64xf32, #tpu.memory_space<vmem>>, vector<32x16x64xf32>
    %c0_8 = arith.constant 0 : index
    %c0_9 = arith.constant 0 : index
    %15 = vector.load %arg5[%c0_8, %c0_9] : memref<2x32xf32, #tpu.memory_space<vmem>>, vector<2x32xf32>
    %16 = vector.extract_strided_slice %13 {offsets = [0, 0], sizes = [16, 64], strides = [1, 1]} : vector<16x128xf32> to vector<16x64xf32>
    %17 = vector.shape_cast %16 : vector<16x64xf32> to vector<1x16x64xf32>
    %18 = vector.broadcast %17 : vector<1x16x64xf32> to vector<32x16x64xf32>
    %19 = arith.mulf %14, %18 : vector<32x16x64xf32>
    %cst_10 = arith.constant dense<0.000000e+00> : vector<32x16xf32>
    %20 = vector.multi_reduction <add>, %19, %cst_10 [2] : vector<32x16x64xf32> to vector<32x16xf32>
    %cst_11 = arith.constant dense<0.000000e+00> : vector<32xf32>
    %21 = vector.multi_reduction <add>, %20, %cst_11 [1] : vector<32x16xf32> to vector<32xf32>
    %22 = vector.shape_cast %21 : vector<32xf32> to vector<32x1xf32>
    %c0_12 = arith.constant 0 : index
    %c0_13 = arith.constant 0 : index
    %23 = vector.load %arg4[%c0_12, %c0_13] : memref<32x1xf32, #tpu.memory_space<vmem>>, vector<32x1xf32>
    %24 = arith.addf %22, %23 : vector<32x1xf32>
    %25 = math.tanh %24 : vector<32x1xf32>
    %cst_14 = arith.constant dense<0.000000e+00> : vector<2x1xf32>
    %26 = tpu.matmul %15, %25, %cst_14 {dimension_numbers = #tpu.dot_dimension_numbers<[1], [0], [0], [1], [0, 0, 1, 1], [], []>} : vector<2x32xf32>, vector<32x1xf32>, vector<2x1xf32> -> vector<2x1xf32>
    %c0_15 = arith.constant 0 : index
    %c0_16 = arith.constant 0 : index
    %27 = vector.load %arg6[%c0_15, %c0_16] : memref<2x1xf32, #tpu.memory_space<vmem>>, vector<2x1xf32>
    %28 = arith.addf %26, %27 : vector<2x1xf32>
    %c0_17 = arith.constant 0 : index
    %c0_18 = arith.constant 0 : index
    %29 = vector.load %arg7[%c0_17, %c0_18] : memref<2x2xf32, #tpu.memory_space<vmem>>, vector<2x1xf32>
    tpu.vector_store %arg7[%c0_17, %c0_18], %28 {strides = array<i32>} : memref<2x2xf32, #tpu.memory_space<vmem>>, vector<2x1xf32>,
    %30 = vector.extract_strided_slice %13 {offsets = [0, 64], sizes = [16, 64], strides = [1, 1]} : vector<16x128xf32> to vector<16x64xf32>
    %31 = vector.shape_cast %30 : vector<16x64xf32> to vector<1x16x64xf32>
    %32 = vector.broadcast %31 : vector<1x16x64xf32> to vector<32x16x64xf32>
    %33 = arith.mulf %14, %32 : vector<32x16x64xf32>
    %cst_19 = arith.constant dense<0.000000e+00> : vector<32x16xf32>
    %34 = vector.multi_reduction <add>, %33, %cst_19 [2] : vector<32x16x64xf32> to vector<32x16xf32>
    %cst_20 = arith.constant dense<0.000000e+00> : vector<32xf32>
    %35 = vector.multi_reduction <add>, %34, %cst_20 [1] : vector<32x16xf32> to vector<32xf32>
    %36 = vector.shape_cast %35 : vector<32xf32> to vector<32x1xf32>
    %c0_21 = arith.constant 0 : index
    %c0_22 = arith.constant 0 : index
    %37 = vector.load %arg4[%c0_21, %c0_22] : memref<32x1xf32, #tpu.memory_space<vmem>>, vector<32x1xf32>
    %38 = arith.addf %36, %37 : vector<32x1xf32>
    %39 = math.tanh %38 : vector<32x1xf32>
    %cst_23 = arith.constant dense<0.000000e+00> : vector<2x1xf32>
    %40 = tpu.matmul %15, %39, %cst_23 {dimension_numbers = #tpu.dot_dimension_numbers<[1], [0], [0], [1], [0, 0, 1, 1], [], []>} : vector<2x32xf32>, vector<32x1xf32>, vector<2x1xf32> -> vector<2x1xf32>
    %c0_24 = arith.constant 0 : index
    %c0_25 = arith.constant 0 : index
    %41 = vector.load %arg6[%c0_24, %c0_25] : memref<2x1xf32, #tpu.memory_space<vmem>>, vector<2x1xf32>
    %42 = arith.addf %40, %41 : vector<2x1xf32>
    %c0_26 = arith.constant 0 : index
    %c1 = arith.constant 1 : index
    %43 = vector.load %arg7[%c0_26, %c1] : memref<2x2xf32, #tpu.memory_space<vmem>>, vector<2x1xf32>
    tpu.vector_store %arg7[%c0_26, %c1], %42 {strides = array<i32>} : memref<2x2xf32, #tpu.memory_space<vmem>>, vector<2x1xf32>,
    return
  }
}

</mosaic_0001>

<bundles_post_ra>
// kernel: netwidth_forward.2
= control target key start
LH: loop header
LB: loop body
LE: loop exit
PB: predicated region body
PF: predicated region fallthrough
CT: control target
= control target key end

     0   :  { %vm95_vm0 = vcmask 1042432   ;;  %vm82_vm1 = vcmask 220160   ;;  %s1422_s2 = inlined_call_operand.vmem [shape: f32[27,2048], index: 2, kind: input, shape index: {}]   ;;  %s1423_s0 = inlined_call_operand.vmem [shape: f32[32,27], index: 0, kind: input, shape index: {}]   ;;  %s1424_s1 = inlined_call_operand.vmem [shape: f32[32,1], index: 1, kind: input, shape index: {}]   ;;  %s1425_s3 = inlined_call_operand.vmem [shape: f32[32,512], index: 3, kind: output, shape index: {}]  }
   0x1   :  { %v66_v0 = vld [vmem:[%s1422_s2 + $0x180] sm:$0x7]  ;;  %v67_v1 = vld [vmem:[%s1422_s2 + $0x188] sm:$0x7]  ;;  %v68_v2 = vld [vmem:[%s1422_s2 + $0x190] sm:$0x7] }
   0x2   :  { %732 = vmatpush.msk.msra.mxu0 %vm95_vm0, %v66_v0  ;;  %737 = vmatpush.msk.msra.mxu1 %vm95_vm0, %v67_v1  ;;  %v69_v3 = vld [vmem:[%s1422_s2 + $0x198] sm:$0x7]  ;;  %v50_v4 = vld [vmem:[%s1422_s2 + $0x100] sm:$0xff]  ;;  %v51_v5 = vld [vmem:[%s1422_s2 + $0x108] sm:$0xff] }
   0x3   :  { %742 = vmatpush.msk.msra.mxu2 %vm95_vm0, %v68_v2  ;;  %747 = vmatpush.msk.msra.mxu3 %vm95_vm0, %v69_v3  ;;  %v52_v6 = vld [vmem:[%s1422_s2 + $0x110] sm:$0xff]  ;;  %v53_v7 = vld [vmem:[%s1422_s2 + $0x118] sm:$0xff]  ;;  %v34_v8 = vld [vmem:[%s1422_s2 + $0x80] sm:$0xff] }
   0x4   :  { %157 = vmatpush.msra.mxu0 %v50_v4  ;;  %186 = vmatpush.msra.mxu1 %v51_v5  ;;  %v35_v9 = vld [vmem:[%s1422_s2 + $0x88] sm:$0xff]  ;;  %v36_v10 = vld [vmem:[%s1422_s2 + $0x90] sm:$0xff]  ;;  %v37_v11 = vld [vmem:[%s1422_s2 + $0x98] sm:$0xff]  ;;  %v847_v5 = vmov 0  }
   0x5   :  { %215 = vmatpush.msra.mxu2 %v52_v6  ;;  %244 = vmatpush.msra.mxu3 %v53_v7  ;;  %v18_v12 = vld [vmem:[%s1422_s2] sm:$0xff]  ;;  %v19_v13 = vld [vmem:[%s1422_s2 + $0x8] sm:$0xff]  ;;  %v20_v14 = vld [vmem:[%s1422_s2 + $0x10] sm:$0xff] }
   0x6   :  { %158 = vmatpush.msra.mxu0 %v34_v8  ;;  %187 = vmatpush.msra.mxu1 %v35_v9  ;;  %v21_v15 = vld [vmem:[%s1422_s2 + $0x18] sm:$0xff]  ;;  %v923_v16 = vld [vmem:[%s1423_s0] sm:$0xff]  ;;  %v72_v17 = vld [vmem:[%s1422_s2 + $0x1b0] sm:$0x7] }
   0x7   :  { %216 = vmatpush.msra.mxu2 %v36_v10  ;;  %245 = vmatpush.msra.mxu3 %v37_v11  ;;  %v73_v18 = vld [vmem:[%s1422_s2 + $0x1b8] sm:$0x7]  ;;  %v70_v19 = vld [vmem:[%s1422_s2 + $0x1a0] sm:$0x7]  ;;  %v71_v20 = vld [vmem:[%s1422_s2 + $0x1a8] sm:$0x7] }
   0x8   :  { %159 = vmatpush.msra.mxu0 %v18_v12  ;;  %188 = vmatpush.msra.mxu1 %v19_v13  ;;  %v56_v21 = vld [vmem:[%s1422_s2 + $0x130] sm:$0xff]  ;;  %v57_v22 = vld [vmem:[%s1422_s2 + $0x138] sm:$0xff]  ;;  %v54_v23 = vld [vmem:[%s1422_s2 + $0x120] sm:$0xff] }
   0x9   :  { %217 = vmatpush.msra.mxu2 %v20_v14  ;;  %246 = vmatpush.msra.mxu3 %v21_v15  ;;  %v55_v24 = vld [vmem:[%s1422_s2 + $0x128] sm:$0xff]  ;;  %v40_v25 = vld [vmem:[%s1422_s2 + $0xb0] sm:$0xff]  ;;  %v41_v26 = vld [vmem:[%s1422_s2 + $0xb8] sm:$0xff] }
   0xa   :  { %733 = vmatmul.msk.f32.vlgmr.msra.gmra.mxu0 %vm82_vm1, %v923_v16  ;;  %738 = vmatmul.msk.f32.vlgmr.msra.gmra.mxu1 %vm82_vm1, %v923_v16  ;;  %v38_v27 = vld [vmem:[%s1422_s2 + $0xa0] sm:$0xff]  ;;  %v39_v28 = vld [vmem:[%s1422_s2 + $0xa8] sm:$0xff]  ;;  %v24_v30 = vld [vmem:[%s1422_s2 + $0x30] sm:$0xff] }
   0xb   :  { %743 = vmatmul.msk.f32.vlgmr.msra.gmra.mxu2 %vm82_vm1, %v923_v16  ;;  %748 = vmatmul.msk.f32.vlgmr.msra.gmra.mxu3 %vm82_vm1, %v923_v16  ;;  %v976_v29 = vld [vmem:[%s1423_s0 + $0x8] sm:$0xff]  ;;  %v25_v31 = vld [vmem:[%s1422_s2 + $0x38] sm:$0xff]  ;;  %v22_v32 = vld [vmem:[%s1422_s2 + $0x20] sm:$0xff] }
   0xc   :  { %762 = vmatpush.msk.msrb.mxu2 %vm95_vm0, %v72_v17  ;;  %767 = vmatpush.msk.msrb.mxu3 %vm95_vm0, %v73_v18  ;;  %v23_v33 = vld [vmem:[%s1422_s2 + $0x28] sm:$0xff]  ;;  %v76_v34 = vld [vmem:[%s1422_s2 + $0x1d0] sm:$0x7]  ;;  %v77_v35 = vld [vmem:[%s1422_s2 + $0x1d8] sm:$0x7] }
   0xd   :  { %752 = vmatpush.msk.msrb.mxu0 %vm95_vm0, %v70_v19  ;;  %757 = vmatpush.msk.msrb.mxu1 %vm95_vm0, %v71_v20  ;;  %v74_v36 = vld [vmem:[%s1422_s2 + $0x1c0] sm:$0x7]  ;;  %v75_v37 = vld [vmem:[%s1422_s2 + $0x1c8] sm:$0x7]  ;;  %v60_v38 = vld [vmem:[%s1422_s2 + $0x150] sm:$0xff] }
   0xe   :  { %331 = vmatpush.msrb.mxu2 %v56_v21  ;;  %360 = vmatpush.msrb.mxu3 %v57_v22  ;;  %v61_v39 = vld [vmem:[%s1422_s2 + $0x158] sm:$0xff]  ;;  %v58_v40 = vld [vmem:[%s1422_s2 + $0x140] sm:$0xff]  ;;  %v59_v41 = vld [vmem:[%s1422_s2 + $0x148] sm:$0xff] }
   0xf   :  { %273 = vmatpush.msrb.mxu0 %v54_v23  ;;  %302 = vmatpush.msrb.mxu1 %v55_v24  ;;  %v1027_v42 = vld [vmem:[%s1423_s0 + $0x10] sm:$0xff]  ;;  %v45_v44 = vld [vmem:[%s1422_s2 + $0xd8] sm:$0xff]  ;;  %v42_v45 = vld [vmem:[%s1422_s2 + $0xc0] sm:$0xff] }
  0x10   :  { %332 = vmatpush.msrb.mxu2 %v40_v25  ;;  %361 = vmatpush.msrb.mxu3 %v41_v26  ;;  %v44_v43 = vld [vmem:[%s1422_s2 + $0xd0] sm:$0xff]  ;;  %v43_v46 = vld [vmem:[%s1422_s2 + $0xc8] sm:$0xff]  ;;  %v1054_v47 = vld [vmem:[%s1423_s0 + $0x18] sm:$0xff] }
  0x11   :  { %274 = vmatpush.msrb.mxu0 %v38_v27  ;;  %303 = vmatpush.msrb.mxu1 %v39_v28  ;;  %v28_v48 = vld [vmem:[%s1422_s2 + $0x50] sm:$0xff]  ;;  %v29_v49 = vld [vmem:[%s1422_s2 + $0x58] sm:$0xff]  ;;  %v26_v50 = vld [vmem:[%s1422_s2 + $0x40] sm:$0xff] }
  0x12   :  { %734 = vmatmul.msk.f32.gmra.mxu0 %vm82_vm1, %v976_v29  ;;  %739 = vmatmul.msk.f32.gmra.mxu1 %vm82_vm1, %v976_v29  ;;  %v27_v51 = vld [vmem:[%s1422_s2 + $0x48] sm:$0xff]  ;;  %v80_v52 = vld [vmem:[%s1422_s2 + $0x1f0] sm:$0x7]  ;;  %v81_v53 = vld [vmem:[%s1422_s2 + $0x1f8] sm:$0x7] }
  0x13   :  { %744 = vmatmul.msk.f32.gmra.mxu2 %vm82_vm1, %v976_v29  ;;  %749 = vmatmul.msk.f32.gmra.mxu3 %vm82_vm1, %v976_v29  ;;  %v78_v54 = vld [vmem:[%s1422_s2 + $0x1e0] sm:$0x7]  ;;  %v79_v55 = vld [vmem:[%s1422_s2 + $0x1e8] sm:$0x7]  ;;  %v64_v56 = vld [vmem:[%s1422_s2 + $0x170] sm:$0xff] }
  0x14   :  { %333 = vmatpush.msrb.mxu2 %v24_v30  ;;  %362 = vmatpush.msrb.mxu3 %v25_v31  ;;  %v65_v57 = vld [vmem:[%s1422_s2 + $0x178] sm:$0xff]  ;;  %v62_v58 = vld [vmem:[%s1422_s2 + $0x160] sm:$0xff]  ;;  %v63_v59 = vld [vmem:[%s1422_s2 + $0x168] sm:$0xff] }
  0x15   :  { %275 = vmatpush.msrb.mxu0 %v22_v32  ;;  %304 = vmatpush.msrb.mxu1 %v23_v33  ;;  %v48_v60 = vld [vmem:[%s1422_s2 + $0xf0] sm:$0xff]  ;;  %v49_v61 = vld [vmem:[%s1422_s2 + $0xf8] sm:$0xff]  ;;  %v46_v62 = vld [vmem:[%s1422_s2 + $0xe0] sm:$0xff] }
  0x16   :  { %782 = vmatpush.msk.msra.mxu2 %vm95_vm0, %v76_v34  ;;  %787 = vmatpush.msk.msra.mxu3 %vm95_vm0, %v77_v35  ;;  %v47_v63 = vld [vmem:[%s1422_s2 + $0xe8] sm:$0xff]  ;;  %v32_v0 = vld [vmem:[%s1422_s2 + $0x70] sm:$0xff]  ;;  %v33_v1 = vld [vmem:[%s1422_s2 + $0x78] sm:$0xff] }
  0x17   :  { %772 = vmatpush.msk.msra.mxu0 %vm95_vm0, %v74_v36  ;;  %777 = vmatpush.msk.msra.mxu1 %vm95_vm0, %v75_v37  ;;  %v30_v2 = vld [vmem:[%s1422_s2 + $0x60] sm:$0xff]  ;;  %v31_v3 = vld [vmem:[%s1422_s2 + $0x68] sm:$0xff]  ;;  %v658_v7 = vld [vmem:[%s1424_s1 + $0x10] sm:$0xff] }
  0x18   :  { %447 = vmatpush.msra.mxu2 %v60_v38  ;;  %476 = vmatpush.msra.mxu3 %v61_v39  ;;  %v656_v4 = vld [vmem:[%s1424_s1] sm:$0xff]  ;;  %v657_v6 = vld [vmem:[%s1424_s1 + $0x8] sm:$0xff]  ;;  %v659_v8 = vld [vmem:[%s1424_s1 + $0x18] sm:$0xff] }
  0x19   :  { %389 = vmatpush.msra.mxu0 %v58_v40  ;;  %418 = vmatpush.msra.mxu1 %v59_v41 }
  0x1a   :  { %735 = vmatmul.msk.f32.gmra.mxu0 %vm82_vm1, %v1027_v42  ;;  %740 = vmatmul.msk.f32.gmra.mxu1 %vm82_vm1, %v1027_v42 }
  0x1b   :  { %745 = vmatmul.msk.f32.gmra.mxu2 %vm82_vm1, %v1027_v42  ;;  %750 = vmatmul.msk.f32.gmra.mxu3 %vm82_vm1, %v1027_v42 }
  0x1c   :  { %448 = vmatpush.msra.mxu2 %v44_v43  ;;  %477 = vmatpush.msra.mxu3 %v45_v44 }
  0x1d   :  { %390 = vmatpush.msra.mxu0 %v42_v45  ;;  %419 = vmatpush.msra.mxu1 %v43_v46 }
  0x1e   :  { %449 = vmatpush.msra.mxu2 %v28_v48  ;;  %478 = vmatpush.msra.mxu3 %v29_v49 }
  0x1f   :  { %391 = vmatpush.msra.mxu0 %v26_v50  ;;  %420 = vmatpush.msra.mxu1 %v27_v51 }
  0x20   :  { %813 = vset.pattern.permute.xlu0 %v847_v5  ;;  %814 = vset.pattern.permute.xlu1 %v847_v5 }
  0x21   :  { %662 = vperm.xlu0 %813, %v656_v4   ;;  %672 = vperm.xlu1 %814, %v658_v7  }
  0x22   :  { %736 = vmatmul.msk.f32.gmra.mxu0 %vm82_vm1, %v1054_v47  ;;  %741 = vmatmul.msk.f32.gmra.mxu1 %vm82_vm1, %v1054_v47 }
  0x23   :  { %746 = vmatmul.msk.f32.gmra.mxu2 %vm82_vm1, %v1054_v47  ;;  %751 = vmatmul.msk.f32.gmra.mxu3 %vm82_vm1, %v1054_v47 }
  0x29   :  { %667 = vperm.xlu0 %813, %v657_v6   ;;  %677 = vperm.xlu1 %814, %v659_v8  }
  0x2a   :  { %753 = vmatmul.msk.f32.vlgmr.msrb.gmra.mxu0 %vm82_vm1, %v923_v16  ;;  %758 = vmatmul.msk.f32.vlgmr.msrb.gmra.mxu1 %vm82_vm1, %v923_v16 }
  0x2b   :  { %763 = vmatmul.msk.f32.vlgmr.msrb.gmra.mxu2 %vm82_vm1, %v923_v16  ;;  %768 = vmatmul.msk.f32.vlgmr.msrb.gmra.mxu3 %vm82_vm1, %v923_v16 }
  0x2c   :  { %802 = vmatpush.msk.msrb.mxu2 %vm95_vm0, %v80_v52  ;;  %807 = vmatpush.msk.msrb.mxu3 %vm95_vm0, %v81_v53 }
  0x2d   :  { %792 = vmatpush.msk.msrb.mxu0 %vm95_vm0, %v78_v54  ;;  %797 = vmatpush.msk.msrb.mxu1 %vm95_vm0, %v79_v55 }
  0x2e   :  { %563 = vmatpush.msrb.mxu2 %v64_v56  ;;  %592 = vmatpush.msrb.mxu3 %v65_v57 }
  0x2f   :  { %505 = vmatpush.msrb.mxu0 %v62_v58  ;;  %534 = vmatpush.msrb.mxu1 %v63_v59 }
  0x30   :  { %564 = vmatpush.msrb.mxu2 %v48_v60  ;;  %593 = vmatpush.msrb.mxu3 %v49_v61 }
  0x31   :  { %506 = vmatpush.msrb.mxu0 %v46_v62  ;;  %535 = vmatpush.msrb.mxu1 %v47_v63 }
  0x32   :  { %754 = vmatmul.msk.f32.gmra.mxu0 %vm82_vm1, %v976_v29  ;;  %759 = vmatmul.msk.f32.gmra.mxu1 %vm82_vm1, %v976_v29 }
  0x33   :  { %764 = vmatmul.msk.f32.gmra.mxu2 %vm82_vm1, %v976_v29  ;;  %769 = vmatmul.msk.f32.gmra.mxu3 %vm82_vm1, %v976_v29 }
  0x34   :  { %565 = vmatpush.msrb.mxu2 %v32_v0  ;;  %594 = vmatpush.msrb.mxu3 %v33_v1 }
  0x35   :  { %507 = vmatpush.msrb.mxu0 %v30_v2  ;;  %536 = vmatpush.msrb.mxu1 %v31_v3 }
  0x3a   :  { %755 = vmatmul.msk.f32.gmra.mxu0 %vm82_vm1, %v1027_v42  ;;  %760 = vmatmul.msk.f32.gmra.mxu1 %vm82_vm1, %v1027_v42 }
  0x3b   :  { %765 = vmatmul.msk.f32.gmra.mxu2 %vm82_vm1, %v1027_v42  ;;  %770 = vmatmul.msk.f32.gmra.mxu3 %vm82_vm1, %v1027_v42 }
  0x42   :  { %756 = vmatmul.msk.f32.gmra.mxu0 %vm82_vm1, %v1054_v47  ;;  %761 = vmatmul.msk.f32.gmra.mxu1 %vm82_vm1, %v1054_v47 }
  0x43   :  { %766 = vmatmul.msk.f32.gmra.mxu2 %vm82_vm1, %v1054_v47  ;;  %771 = vmatmul.msk.f32.gmra.mxu3 %vm82_vm1, %v1054_v47 }
  0x4a   :  { %773 = vmatmul.msk.f32.vlgmr.msra.gmra.mxu0 %vm82_vm1, %v923_v16  ;;  %778 = vmatmul.msk.f32.vlgmr.msra.gmra.mxu1 %vm82_vm1, %v923_v16 }
  0x4b   :  { %783 = vmatmul.msk.f32.vlgmr.msra.gmra.mxu2 %vm82_vm1, %v923_v16  ;;  %788 = vmatmul.msk.f32.vlgmr.msra.gmra.mxu3 %vm82_vm1, %v923_v16 }
  0x52   :  { %774 = vmatmul.msk.f32.gmra.mxu0 %vm82_vm1, %v976_v29  ;;  %779 = vmatmul.msk.f32.gmra.mxu1 %vm82_vm1, %v976_v29 }
  0x53   :  { %784 = vmatmul.msk.f32.gmra.mxu2 %vm82_vm1, %v976_v29  ;;  %789 = vmatmul.msk.f32.gmra.mxu3 %vm82_vm1, %v976_v29 }
  0x5a   :  { %775 = vmatmul.msk.f32.gmra.mxu0 %vm82_vm1, %v1027_v42  ;;  %780 = vmatmul.msk.f32.gmra.mxu1 %vm82_vm1, %v1027_v42 }
  0x5b   :  { %785 = vmatmul.msk.f32.gmra.mxu2 %vm82_vm1, %v1027_v42  ;;  %790 = vmatmul.msk.f32.gmra.mxu3 %vm82_vm1, %v1027_v42 }
  0x62   :  { %776 = vmatmul.msk.f32.gmra.mxu0 %vm82_vm1, %v1054_v47  ;;  %781 = vmatmul.msk.f32.gmra.mxu1 %vm82_vm1, %v1054_v47 }
  0x63   :  { %786 = vmatmul.msk.f32.gmra.mxu2 %vm82_vm1, %v1054_v47  ;;  %791 = vmatmul.msk.f32.gmra.mxu3 %vm82_vm1, %v1054_v47 }
  0x6a   :  { %793 = vmatmul.msk.f32.vlgmr.msrb.gmra.mxu0 %vm82_vm1, %v923_v16  ;;  %798 = vmatmul.msk.f32.vlgmr.msrb.gmra.mxu1 %vm82_vm1, %v923_v16 }
  0x6b   :  { %803 = vmatmul.msk.f32.vlgmr.msrb.gmra.mxu2 %vm82_vm1, %v923_v16  ;;  %808 = vmatmul.msk.f32.vlgmr.msrb.gmra.mxu3 %vm82_vm1, %v923_v16 }
  0x72   :  { %794 = vmatmul.msk.f32.gmra.mxu0 %vm82_vm1, %v976_v29  ;;  %799 = vmatmul.msk.f32.gmra.mxu1 %vm82_vm1, %v976_v29 }
  0x73   :  { %804 = vmatmul.msk.f32.gmra.mxu2 %vm82_vm1, %v976_v29  ;;  %809 = vmatmul.msk.f32.gmra.mxu3 %vm82_vm1, %v976_v29 }
  0x7a   :  { %795 = vmatmul.msk.f32.gmra.mxu0 %vm82_vm1, %v1027_v42  ;;  %800 = vmatmul.msk.f32.gmra.mxu1 %vm82_vm1, %v1027_v42 }
  0x7b   :  { %805 = vmatmul.msk.f32.gmra.mxu2 %vm82_vm1, %v1027_v42  ;;  %810 = vmatmul.msk.f32.gmra.mxu3 %vm82_vm1, %v1027_v42 }
  0x82   :  { %796 = vmatmul.msk.f32.gmra.mxu0 %vm82_vm1, %v1054_v47  ;;  %801 = vmatmul.msk.f32.gmra.mxu1 %vm82_vm1, %v1054_v47 }
  0x83   :  { %806 = vmatmul.msk.f32.gmra.mxu2 %vm82_vm1, %v1054_v47  ;;  %811 = vmatmul.msk.f32.gmra.mxu3 %vm82_vm1, %v1054_v47 }
  0x87   :  { %v1236_v9 = vpop.f32.mrf.mxu0  ;;  %v1238_v10 = vpop.f32.mrf.mxu1 }
  0x8e   :  { %v1240_v11 = vpop.f32.mrf.mxu2  ;;  %v1242_v12 = vpop.f32.mrf.mxu3 }
  0x8f   :  { %v1244_v13 = vpop.f32.mrf.mxu0  ;;  %v1246_v14 = vpop.f32.mrf.mxu1 }
  0x93   :  { %v663_v7 = vpop.permute.xlu0 %662 }
  0x96   :  { %v1248_v15 = vpop.f32.mrf.mxu2  ;;  %v1250_v16 = vpop.f32.mrf.mxu3 }
  0x97   :  { %v1252_v17 = vpop.f32.mrf.mxu0  ;;  %v1254_v18 = vpop.f32.mrf.mxu1 }
  0x9b   :  { %v668_v43 = vpop.permute.xlu0 %667 }
  0x9e   :  { %v1256_v19 = vpop.f32.mrf.mxu2  ;;  %v1258_v20 = vpop.f32.mrf.mxu3 }
  0x9f   :  { %v1260_v21 = vpop.f32.mrf.mxu0  ;;  %v1262_v22 = vpop.f32.mrf.mxu1 }
  0xa6   :  { %v1264_v23 = vpop.f32.mrf.mxu2  ;;  %v1266_v24 = vpop.f32.mrf.mxu3 }
  0xa7   :  { %v277_v25 = vpop.f32.mrf.mxu0  ;;  %v306_v26 = vpop.f32.mrf.mxu1 }
  0xa8   :  { %v608_v27 = vmax.f32 %v1236_v9, %v277_v25  ;;  %v609_v28 = vmax.f32 %v1238_v10, %v306_v26 }
  0xae   :  { %v1270_v29 = vpop.f32.mrf.mxu2  ;;  %v1272_v30 = vpop.f32.mrf.mxu3 }
  0xaf   :  { %v610_v31 = vmax.f32 %v1240_v11, %v1270_v29  ;;  %v611_v32 = vmax.f32 %v1242_v12, %v1272_v30  ;;  %v1278_v33 = vpop.f32.mrf.mxu0  ;;  %v1280_v34 = vpop.f32.mrf.mxu1 }
  0xb0   :  { %v612_v35 = vmax.f32 %v1244_v13, %v1278_v33  ;;  %v613_v36 = vmax.f32 %v1246_v14, %v1280_v34 }
  0xb6   :  { %v1286_v37 = vpop.f32.mrf.mxu2  ;;  %v1288_v38 = vpop.f32.mrf.mxu3 }
  0xb7   :  { %v614_v39 = vmax.f32 %v1248_v15, %v1286_v37  ;;  %v1294_v41 = vpop.f32.mrf.mxu0  ;;  %v1296_v42 = vpop.f32.mrf.mxu1 }
  0xbe   :  { %v1302_v45 = vpop.f32.mrf.mxu2  ;;  %v1304_v46 = vpop.f32.mrf.mxu3 }
  0xbf   :  { %v1310_v49 = vpop.f32.mrf.mxu0  ;;  %v1312_v50 = vpop.f32.mrf.mxu1 }
  0xc6   :  { %v1318_v53 = vpop.f32.mrf.mxu2  ;;  %v1320_v54 = vpop.f32.mrf.mxu3 }
  0xc7   :  { %v393_v57 = vpop.f32.mrf.mxu0  ;;  %v422_v58 = vpop.f32.mrf.mxu1 }
  0xce   :  { %v451_v59 = vpop.f32.mrf.mxu2  ;;  %v480_v60 = vpop.f32.mrf.mxu3 }
  0xcf   :  { %v396_v61 = vpop.f32.mrf.mxu0  ;;  %v425_v62 = vpop.f32.mrf.mxu1 }
  0xd6   :  { %v454_v63 = vpop.f32.mrf.mxu2  ;;  %v483_v0 = vpop.f32.mrf.mxu3 }
  0xd7   :  { %v399_v1 = vpop.f32.mrf.mxu0  ;;  %v428_v2 = vpop.f32.mrf.mxu1 }
  0xde   :  { %v1326_v3 = vpop.f32.mrf.mxu2  ;;  %v1328_v4 = vpop.f32.mrf.mxu3 }
  0xdf   :  { %v1330_v5 = vpop.f32.mrf.mxu0  ;;  %v1332_v6 = vpop.f32.mrf.mxu1 }
  0xe6   :  { %v1334_v8 = vpop.f32.mrf.mxu2  ;;  %v1336_v9 = vpop.f32.mrf.mxu3 }
  0xe7   :  { %v509_v10 = vpop.f32.mrf.mxu0  ;;  %v538_v11 = vpop.f32.mrf.mxu1 }
  0xe8   :  { %v624_v12 = vmax.f32 %v393_v57, %v509_v10  ;;  %v625_v13 = vmax.f32 %v422_v58, %v538_v11 }
  0xea   :  { %v640_v14 = vmax.f32 %v608_v27, %v624_v12  ;;  %v641_v25 = vmax.f32 %v609_v28, %v625_v13 }
  0xec   :  { %v680_v26 = vadd.f32 %v663_v7, %v640_v14  ;;  %v681_v29 = vadd.f32 %v663_v7, %v641_v25  ;;  %v1429_v14 = vmax.f32 %v1256_v19, %v1302_v45 }
  0xee   :  { %815 = vtanh.f32 %v680_v26  ;;  %v567_v30 = vpop.f32.mrf.mxu2  ;;  %v596_v33 = vpop.f32.mrf.mxu3  ;;  %v1430_v26 = vmax.f32 %v1258_v20, %v1304_v46 }
  0xef   :  { %817 = vtanh.f32 %v681_v29  ;;  %v626_v34 = vmax.f32 %v451_v59, %v567_v30  ;;  %v627_v56 = vmax.f32 %v480_v60, %v596_v33  ;;  %v512_v55 = vpop.f32.mrf.mxu0  ;;  %v541_v52 = vpop.f32.mrf.mxu1  ;;  %v1427_v59 = vmax.f32 %v1252_v17, %v1294_v41 }
  0xf0   :  { %v628_v51 = vmax.f32 %v396_v61, %v512_v55  ;;  %v629_v48 = vmax.f32 %v425_v62, %v541_v52  ;;  %v1426_v52 = vmax.f32 %v1250_v16, %v1288_v38  ;;  %v1428_v61 = vmax.f32 %v1254_v18, %v1296_v42 }
  0xf1   :  { %v642_v47 = vmax.f32 %v610_v31, %v626_v34  ;;  %v643_v44 = vmax.f32 %v611_v32, %v627_v56  ;;  %v673_v56 = vpop.permute.xlu1 %672 }
  0xf2   :  { %v644_v40 = vmax.f32 %v612_v35, %v628_v51  ;;  %v645_v57 = vmax.f32 %v613_v36, %v629_v48 }
  0xf3   :  { %v682_v58 = vadd.f32 %v663_v7, %v642_v47  ;;  %v683_v27 = vadd.f32 %v663_v7, %v643_v44 }
  0xf4   :  { %v816_v28 = vpop.eup %815  ;;  %v684_v10 = vadd.f32 %v668_v43, %v644_v40  ;;  %v685_v11 = vadd.f32 %v668_v43, %v645_v57 }
  0xf5   :  { %v818_v12 = vpop.eup %817  ;;  %712 = vst [vmem:[%s1425_s3] sm:$0xff] %v816_v28  ;;  %819 = vtanh.f32 %v682_v58 }
  0xf6   :  { %713 = vst [vmem:[%s1425_s3 + $0x8] sm:$0xff] %v818_v12  ;;  %821 = vtanh.f32 %v683_v27  ;;  %v570_v31 = vpop.f32.mrf.mxu2  ;;  %v599_v32 = vpop.f32.mrf.mxu3  ;;  %v1433_v27 = vmax.f32 %v1264_v23, %v1318_v53 }
  0xf7   :  { %823 = vtanh.f32 %v684_v10  ;;  %v630_v35 = vmax.f32 %v454_v63, %v570_v31  ;;  %v631_v36 = vmax.f32 %v483_v0, %v599_v32  ;;  %v515_v44 = vpop.f32.mrf.mxu0  ;;  %v544_v47 = vpop.f32.mrf.mxu1  ;;  %v1434_v10 = vmax.f32 %v1266_v24, %v1320_v54 }
  0xf8   :  { %825 = vtanh.f32 %v685_v11  ;;  %v632_v40 = vmax.f32 %v399_v1, %v515_v44  ;;  %v633_v48 = vmax.f32 %v428_v2, %v544_v47 }
  0xf9   :  { %v646_v51 = vmax.f32 %v614_v39, %v630_v35  ;;  %v647_v55 = vmax.f32 %v1426_v52, %v631_v36 }
  0xfa   :  { %v648_v60 = vmax.f32 %v1427_v59, %v632_v40  ;;  %v649_v62 = vmax.f32 %v1428_v61, %v633_v48 }
  0xfb   :  { %v820_v63 = vpop.eup %819  ;;  %v686_v0 = vadd.f32 %v668_v43, %v646_v51  ;;  %v687_v1 = vadd.f32 %v668_v43, %v647_v55 }
  0xfc   :  { %v822_v2 = vpop.eup %821  ;;  %714 = vst [vmem:[%s1425_s3 + $0x10] sm:$0xff] %v820_v63  ;;  %v688_v15 = vadd.f32 %v673_v56, %v648_v60  ;;  %v689_v16 = vadd.f32 %v673_v56, %v649_v62 }
  0xfd   :  { %v824_v37 = vpop.eup %823  ;;  %715 = vst [vmem:[%s1425_s3 + $0x18] sm:$0xff] %v822_v2  ;;  %827 = vtanh.f32 %v686_v0 }
  0xfe   :  { %v826_v17 = vpop.eup %825  ;;  %716 = vst [vmem:[%s1425_s3 + $0x20] sm:$0xff] %v824_v37  ;;  %829 = vtanh.f32 %v687_v1  ;;  %v573_v18 = vpop.f32.mrf.mxu2 }
  0xff   :  { %v602_v38 = vpop.f32.mrf.mxu3  ;;  %717 = vst [vmem:[%s1425_s3 + $0x28] sm:$0xff] %v826_v17  ;;  %831 = vtanh.f32 %v688_v15  ;;  %v634_v39 = vmax.f32 %v1326_v3, %v573_v18  ;;  %v518_v42 = vpop.f32.mrf.mxu0  ;;  %v1431_v3 = vmax.f32 %v1260_v21, %v1310_v49 }
 0x100   :  { %v635_v41 = vmax.f32 %v1328_v4, %v602_v38  ;;  %v547_v43 = vpop.f32.mrf.mxu1  ;;  %833 = vtanh.f32 %v689_v16  ;;  %v636_v7 = vmax.f32 %v1330_v5, %v518_v42  ;;  %v1432_v4 = vmax.f32 %v1262_v22, %v1312_v50 }
 0x101   :  { %v637_v13 = vmax.f32 %v1332_v6, %v547_v43  ;;  %v650_v25 = vmax.f32 %v1429_v14, %v634_v39  ;;  %v678_v6 = vpop.permute.xlu1 %677 }
 0x102   :  { %v651_v29 = vmax.f32 %v1430_v26, %v635_v41  ;;  %v652_v30 = vmax.f32 %v1431_v3, %v636_v7 }
 0x103   :  { %v653_v33 = vmax.f32 %v1432_v4, %v637_v13  ;;  %v828_v34 = vpop.eup %827  ;;  %v690_v5 = vadd.f32 %v673_v56, %v650_v25 }
 0x104   :  { %v691_v57 = vadd.f32 %v673_v56, %v651_v29  ;;  %v830_v58 = vpop.eup %829  ;;  %718 = vst [vmem:[%s1425_s3 + $0x30] sm:$0xff] %v828_v34  ;;  %v692_v19 = vadd.f32 %v678_v6, %v652_v30 }
 0x105   :  { %v693_v20 = vadd.f32 %v678_v6, %v653_v33  ;;  %v832_v45 = vpop.eup %831  ;;  %719 = vst [vmem:[%s1425_s3 + $0x38] sm:$0xff] %v830_v58  ;;  %835 = vtanh.f32 %v690_v5 }
 0x106   :  { %v834_v21 = vpop.eup %833  ;;  %720 = vst [vmem:[%s1425_s3 + $0x40] sm:$0xff] %v832_v45  ;;  %837 = vtanh.f32 %v691_v57  ;;  %v576_v22 = vpop.f32.mrf.mxu2 }
 0x107   :  { %v605_v46 = vpop.f32.mrf.mxu3  ;;  %721 = vst [vmem:[%s1425_s3 + $0x48] sm:$0xff] %v834_v21  ;;  %839 = vtanh.f32 %v692_v19  ;;  %v638_v49 = vmax.f32 %v1334_v8, %v576_v22 }
 0x108   :  { %v639_v50 = vmax.f32 %v1336_v9, %v605_v46  ;;  %841 = vtanh.f32 %v693_v20 }
 0x109   :  { %v654_v28 = vmax.f32 %v1433_v27, %v638_v49 }
 0x10a   :  { %v655_v11 = vmax.f32 %v1434_v10, %v639_v50 }
 0x10b   :  { %v836_v12 = vpop.eup %835  ;;  %v694_v31 = vadd.f32 %v678_v6, %v654_v28 }
 0x10c   :  { %v695_v32 = vadd.f32 %v678_v6, %v655_v11  ;;  %v838_v35 = vpop.eup %837  ;;  %722 = vst [vmem:[%s1425_s3 + $0x50] sm:$0xff] %v836_v12 }
 0x10d   :  { %v840_v8 = vpop.eup %839  ;;  %723 = vst [vmem:[%s1425_s3 + $0x58] sm:$0xff] %v838_v35  ;;  %843 = vtanh.f32 %v694_v31 }
 0x10e   :  { %v842_v23 = vpop.eup %841  ;;  %724 = vst [vmem:[%s1425_s3 + $0x60] sm:$0xff] %v840_v8  ;;  %845 = vtanh.f32 %v695_v32 }
 0x10f   :  { %725 = vst [vmem:[%s1425_s3 + $0x68] sm:$0xff] %v842_v23 }
 0x113   :  { %v844_v24 = vpop.eup %843 }
 0x114   :  { %v846_v53 = vpop.eup %845  ;;  %726 = vst [vmem:[%s1425_s3 + $0x70] sm:$0xff] %v844_v24 }
 0x115   :  { %727 = vst [vmem:[%s1425_s3 + $0x78] sm:$0xff] %v846_v53 }

// kernel: netwidth_forward.3
= control target key start
LH: loop header
LB: loop body
LE: loop exit
PB: predicated region body
PF: predicated region fallthrough
CT: control target
= control target key end

     0   :  { %vm176_vm0 = vcmask 261120   ;;  %vm610_vm1 = vcmask 523264   ;;  %s1611_s25 = smov 64   ;;  %vm967_vm2 = vcmask 1041409   ;;  %vm872_vm3 = vcmask 130112   ;;  %s1612_s24 = smov 1   ;;  %s3376_s2 = inlined_call_operand.vmem [shape: f32[288,512], index: 2, kind: input, shape index: {}]   ;;  %s3377_s0 = inlined_call_operand.vmem [shape: f32[16,288], index: 0, kind: input, shape index: {}]   ;;  %s3378_s1 = inlined_call_operand.vmem [shape: f32[16,1], index: 1, kind: input, shape index: {}]   ;;  %s3379_s3 = inlined_call_operand.vmem [shape: f32[32,16,64], index: 3, kind: input, shape index: {}]   ;;  %s3380_s4 = inlined_call_operand.vmem [shape: f32[32,1], index: 4, kind: input, shape index: {}]   ;;  %s3381_s5 = inlined_call_operand.vmem [shape: f32[2,32], index: 5, kind: input, shape index: {}]   ;;  %s3382_s6 = inlined_call_operand.vmem [shape: f32[2,1], index: 6, kind: input, shape index: {}]   ;;  %s3383_s7 = inlined_call_operand.vmem [shape: f32[2,2], index: 7, kind: output, shape index: {}]  }
   0x1   :  { %v92_v0 = vld [vmem:[%s3376_s2 + $0x1e0] sm:$0xff]  ;;  %v93_v2 = vld [vmem:[%s3376_s2 + $0x1e8] sm:$0xff]  ;;  %v1800_v48 = vld [vmem:[%s3377_s0 + $0x10] sm:$0xff]  ;;  %vm969_vm4 = vcmask 1042434   ;;  %vm971_vm5 = vcmask 1043459   ;;  %vm973_vm6 = vcmask 1044484  }
   0x2   :  { %v172_v1 = vld [vmem:[%s3376_s2 + $0x460] sm:$0xff]  ;;  %183 = vmatpush.msra.mxu0 %v92_v0  ;;  %252 = vmatpush.msra.mxu3 %v93_v2  ;;  %v89_v6 = vld [vmem:[%s3376_s2 + $0x1c8] sm:$0xff]  ;;  %vm975_vm7 = vcmask 1045509   ;;  %vm977_vm8 = vcmask 1046534   ;;  %vm979_vm9 = vcmask 1047559   ;;  %vm1006_vm10 = vcmask 130048  }
   0x3   :  { %241 = vmatpush.msra.mxu2 %v172_v1  ;;  %v156_v3 = vld [vmem:[%s3376_s2 + $0x3e0] sm:$0xff]  ;;  %v85_v10 = vld [vmem:[%s3376_s2 + $0x1a8] sm:$0xff]  ;;  %vm1055_vm11 = vcmask 1024   ;;  %vm1562_vm12 = vcmask 9224  }
   0x4   :  { %v88_v4 = vld [vmem:[%s3376_s2 + $0x1c0] sm:$0xff]  ;;  %206 = vmatpush.msra.mxu1 %v156_v3  ;;  %253 = vmatpush.msra.mxu3 %v89_v6  ;;  %v81_v14 = vld [vmem:[%s3376_s2 + $0x188] sm:$0xff]  ;;  %v158_v3 = vld [vmem:[%s3376_s2 + $0x3f0] sm:$0xff] }
   0x5   :  { %v168_v5 = vld [vmem:[%s3376_s2 + $0x440] sm:$0xff]  ;;  %184 = vmatpush.msra.mxu0 %v88_v4  ;;  %v157_v16 = vld [vmem:[%s3376_s2 + $0x3e8] sm:$0xff]  ;;  %v154_v6 = vld [vmem:[%s3376_s2 + $0x3d0] sm:$0xff] }
   0x6   :  { %v152_v7 = vld [vmem:[%s3376_s2 + $0x3c0] sm:$0xff]  ;;  %242 = vmatpush.msra.mxu2 %v168_v5  ;;  %254 = vmatpush.msra.mxu3 %v85_v10  ;;  %v77_v18 = vld [vmem:[%s3376_s2 + $0x168] sm:$0xff]  ;;  %v90_v10 = vld [vmem:[%s3376_s2 + $0x1d0] sm:$0xff] }
   0x7   :  { %v84_v8 = vld [vmem:[%s3376_s2 + $0x1a0] sm:$0xff]  ;;  %207 = vmatpush.msra.mxu1 %v152_v7  ;;  %v153_v20 = vld [vmem:[%s3376_s2 + $0x3c8] sm:$0xff]  ;;  %v94_v7 = vld [vmem:[%s3376_s2 + $0x1f0] sm:$0xff] }
   0x8   :  { %v164_v9 = vld [vmem:[%s3376_s2 + $0x420] sm:$0xff]  ;;  %185 = vmatpush.msra.mxu0 %v84_v8  ;;  %255 = vmatpush.msra.mxu3 %v81_v14  ;;  %v73_v22 = vld [vmem:[%s3376_s2 + $0x148] sm:$0xff]  ;;  %v86_v14 = vld [vmem:[%s3376_s2 + $0x1b0] sm:$0xff] }
   0x9   :  { %v148_v11 = vld [vmem:[%s3376_s2 + $0x3a0] sm:$0xff]  ;;  %243 = vmatpush.msra.mxu2 %v164_v9  ;;  %v149_v24 = vld [vmem:[%s3376_s2 + $0x3a8] sm:$0xff]  ;;  %v150_v9 = vld [vmem:[%s3376_s2 + $0x3b0] sm:$0xff] }
   0xa   :  { %v80_v12 = vld [vmem:[%s3376_s2 + $0x180] sm:$0xff]  ;;  %208 = vmatpush.msra.mxu1 %v148_v11  ;;  %256 = vmatpush.msra.mxu3 %v77_v18  ;;  %v69_v26 = vld [vmem:[%s3376_s2 + $0x128] sm:$0xff]  ;;  %v142_v18 = vld [vmem:[%s3376_s2 + $0x370] sm:$0xff] }
   0xb   :  { %v160_v13 = vld [vmem:[%s3376_s2 + $0x400] sm:$0xff]  ;;  %186 = vmatpush.msra.mxu0 %v80_v12  ;;  %v145_v28 = vld [vmem:[%s3376_s2 + $0x388] sm:$0xff] }
   0xc   :  { %v144_v15 = vld [vmem:[%s3376_s2 + $0x380] sm:$0xff]  ;;  %244 = vmatpush.msra.mxu2 %v160_v13  ;;  %257 = vmatpush.msra.mxu3 %v73_v22  ;;  %v65_v30 = vld [vmem:[%s3376_s2 + $0x108] sm:$0xff]  ;;  %v146_v13 = vld [vmem:[%s3376_s2 + $0x390] sm:$0xff] }
   0xd   :  { %v76_v17 = vld [vmem:[%s3376_s2 + $0x160] sm:$0xff]  ;;  %209 = vmatpush.msra.mxu1 %v144_v15  ;;  %v141_v32 = vld [vmem:[%s3376_s2 + $0x368] sm:$0xff]  ;;  %1568 = vmatmul.msk.f32.vlgmr.msra.gmra.mxu2 %vm176_vm0, %v1800_v48 }
   0xe   :  { %v140_v19 = vld [vmem:[%s3376_s2 + $0x360] sm:$0xff]  ;;  %275 = vmatpush.msrb.mxu2 %v157_v16  ;;  %187 = vmatpush.msra.mxu0 %v76_v17  ;;  %v61_v34 = vld [vmem:[%s3376_s2 + $0xe8] sm:$0xff]  ;;  %v1911_v16 = vld [vmem:[%s3377_s0 + $0x18] sm:$0xff] }
   0xf   :  { %v72_v21 = vld [vmem:[%s3376_s2 + $0x140] sm:$0xff]  ;;  %210 = vmatpush.msra.mxu1 %v140_v19  ;;  %258 = vmatpush.msra.mxu3 %v69_v26  ;;  %v137_v36 = vld [vmem:[%s3376_s2 + $0x348] sm:$0xff]  ;;  %v174_v17 = vld [vmem:[%s3376_s2 + $0x470] sm:$0xff] }
  0x10   :  { %v136_v23 = vld [vmem:[%s3376_s2 + $0x340] sm:$0xff]  ;;  %276 = vmatpush.msrb.mxu2 %v153_v20  ;;  %188 = vmatpush.msra.mxu0 %v72_v21  ;;  %v57_v38 = vld [vmem:[%s3376_s2 + $0xc8] sm:$0xff]  ;;  %v170_v20 = vld [vmem:[%s3376_s2 + $0x450] sm:$0xff] }
  0x11   :  { %v68_v25 = vld [vmem:[%s3376_s2 + $0x120] sm:$0xff]  ;;  %211 = vmatpush.msra.mxu1 %v136_v23  ;;  %259 = vmatpush.msra.mxu3 %v65_v30  ;;  %v133_v40 = vld [vmem:[%s3376_s2 + $0x328] sm:$0xff]  ;;  %v138_v21 = vld [vmem:[%s3376_s2 + $0x350] sm:$0xff] }
  0x12   :  { %v132_v27 = vld [vmem:[%s3376_s2 + $0x320] sm:$0xff]  ;;  %277 = vmatpush.msrb.mxu2 %v149_v24  ;;  %189 = vmatpush.msra.mxu0 %v68_v25  ;;  %v53_v42 = vld [vmem:[%s3376_s2 + $0xa8] sm:$0xff]  ;;  %v82_v23 = vld [vmem:[%s3376_s2 + $0x190] sm:$0xff] }
  0x13   :  { %v64_v29 = vld [vmem:[%s3376_s2 + $0x100] sm:$0xff]  ;;  %212 = vmatpush.msra.mxu1 %v132_v27  ;;  %260 = vmatpush.msra.mxu3 %v61_v34  ;;  %v129_v44 = vld [vmem:[%s3376_s2 + $0x308] sm:$0xff]  ;;  %v166_v24 = vld [vmem:[%s3376_s2 + $0x430] sm:$0xff] }
  0x14   :  { %v128_v31 = vld [vmem:[%s3376_s2 + $0x300] sm:$0xff]  ;;  %278 = vmatpush.msrb.mxu2 %v145_v28  ;;  %190 = vmatpush.msra.mxu0 %v64_v29  ;;  %v49_v46 = vld [vmem:[%s3376_s2 + $0x88] sm:$0xff]  ;;  %v134_v25 = vld [vmem:[%s3376_s2 + $0x330] sm:$0xff] }
  0x15   :  { %v60_v33 = vld [vmem:[%s3376_s2 + $0xe0] sm:$0xff]  ;;  %213 = vmatpush.msra.mxu1 %v128_v31  ;;  %261 = vmatpush.msra.mxu3 %v57_v38  ;;  %v125_v50 = vld [vmem:[%s3376_s2 + $0x2e8] sm:$0xff]  ;;  %v78_v27 = vld [vmem:[%s3376_s2 + $0x170] sm:$0xff] }
  0x16   :  { %v124_v35 = vld [vmem:[%s3376_s2 + $0x2e0] sm:$0xff]  ;;  %279 = vmatpush.msrb.mxu2 %v141_v32  ;;  %191 = vmatpush.msra.mxu0 %v60_v33  ;;  %v45_v51 = vld [vmem:[%s3376_s2 + $0x68] sm:$0xff]  ;;  %v162_v28 = vld [vmem:[%s3376_s2 + $0x410] sm:$0xff] }
  0x17   :  { %v56_v37 = vld [vmem:[%s3376_s2 + $0xc0] sm:$0xff]  ;;  %214 = vmatpush.msra.mxu1 %v124_v35  ;;  %262 = vmatpush.msra.mxu3 %v53_v42  ;;  %v121_v54 = vld [vmem:[%s3376_s2 + $0x2c8] sm:$0xff]  ;;  %v130_v29 = vld [vmem:[%s3376_s2 + $0x310] sm:$0xff] }
  0x18   :  { %v120_v39 = vld [vmem:[%s3376_s2 + $0x2c0] sm:$0xff]  ;;  %280 = vmatpush.msrb.mxu2 %v137_v36  ;;  %192 = vmatpush.msra.mxu0 %v56_v37  ;;  %v41_v55 = vld [vmem:[%s3376_s2 + $0x48] sm:$0xff]  ;;  %v159_v30 = vld [vmem:[%s3376_s2 + $0x3f8] sm:$0xff] }
  0x19   :  { %v52_v41 = vld [vmem:[%s3376_s2 + $0xa0] sm:$0xff]  ;;  %215 = vmatpush.msra.mxu1 %v120_v39  ;;  %263 = vmatpush.msra.mxu3 %v49_v46  ;;  %v117_v58 = vld [vmem:[%s3376_s2 + $0x2a8] sm:$0xff]  ;;  %v74_v32 = vld [vmem:[%s3376_s2 + $0x150] sm:$0xff] }
  0x1a   :  { %v116_v43 = vld [vmem:[%s3376_s2 + $0x2a0] sm:$0xff]  ;;  %281 = vmatpush.msrb.mxu2 %v133_v40  ;;  %193 = vmatpush.msra.mxu0 %v52_v41  ;;  %v37_v59 = vld [vmem:[%s3376_s2 + $0x28] sm:$0xff]  ;;  %v126_v33 = vld [vmem:[%s3376_s2 + $0x2f0] sm:$0xff] }
  0x1b   :  { %v48_v45 = vld [vmem:[%s3376_s2 + $0x80] sm:$0xff]  ;;  %216 = vmatpush.msra.mxu1 %v116_v43  ;;  %264 = vmatpush.msra.mxu3 %v45_v51  ;;  %v113_v62 = vld [vmem:[%s3376_s2 + $0x288] sm:$0xff]  ;;  %v155_v34 = vld [vmem:[%s3376_s2 + $0x3d8] sm:$0xff] }
  0x1c   :  { %v112_v47 = vld [vmem:[%s3376_s2 + $0x280] sm:$0xff]  ;;  %282 = vmatpush.msrb.mxu2 %v129_v44  ;;  %194 = vmatpush.msra.mxu0 %v48_v45  ;;  %v33_v63 = vld [vmem:[%s3376_s2 + $0x8] sm:$0xff]  ;;  %v70_v35 = vld [vmem:[%s3376_s2 + $0x130] sm:$0xff] }
  0x1d   :  { %v44_v49 = vld [vmem:[%s3376_s2 + $0x60] sm:$0xff]  ;;  %217 = vmatpush.msra.mxu1 %v112_v47  ;;  %265 = vmatpush.msra.mxu3 %v41_v55  ;;  %v1860_v2 = vld [vmem:[%s3377_s0 + $0x28] sm:$0xff]  ;;  %v95_v36 = vld [vmem:[%s3376_s2 + $0x1f8] sm:$0xff] }
  0x1e   :  { %v108_v52 = vld [vmem:[%s3376_s2 + $0x260] sm:$0xff]  ;;  %195 = vmatpush.msra.mxu0 %v44_v49  ;;  %283 = vmatpush.msrb.mxu2 %v125_v50  ;;  %v109_v4 = vld [vmem:[%s3376_s2 + $0x268] sm:$0xff]  ;;  %v122_v37 = vld [vmem:[%s3376_s2 + $0x2d0] sm:$0xff] }
  0x1f   :  { %v40_v53 = vld [vmem:[%s3376_s2 + $0x40] sm:$0xff]  ;;  %218 = vmatpush.msra.mxu1 %v108_v52  ;;  %266 = vmatpush.msra.mxu3 %v37_v59  ;;  %v1871_v5 = vld [vmem:[%s3377_s0 + $0x8] sm:$0xff]  ;;  %v151_v38 = vld [vmem:[%s3376_s2 + $0x3b8] sm:$0xff] }
  0x20   :  { %v104_v56 = vld [vmem:[%s3376_s2 + $0x240] sm:$0xff]  ;;  %196 = vmatpush.msra.mxu0 %v40_v53  ;;  %284 = vmatpush.msrb.mxu2 %v121_v54  ;;  %v105_v8 = vld [vmem:[%s3376_s2 + $0x248] sm:$0xff]  ;;  %v66_v39 = vld [vmem:[%s3376_s2 + $0x110] sm:$0xff] }
  0x21   :  { %v36_v57 = vld [vmem:[%s3376_s2 + $0x20] sm:$0xff]  ;;  %219 = vmatpush.msra.mxu1 %v104_v56  ;;  %267 = vmatpush.msra.mxu3 %v33_v63  ;;  %v101_v11 = vld [vmem:[%s3376_s2 + $0x228] sm:$0xff]  ;;  %v91_v40 = vld [vmem:[%s3376_s2 + $0x1d8] sm:$0xff] }
  0x22   :  { %v100_v60 = vld [vmem:[%s3376_s2 + $0x220] sm:$0xff]  ;;  %197 = vmatpush.msra.mxu0 %v36_v57  ;;  %285 = vmatpush.msrb.mxu2 %v117_v58  ;;  %v173_v12 = vld [vmem:[%s3376_s2 + $0x468] sm:$0xff]  ;;  %v118_v41 = vld [vmem:[%s3376_s2 + $0x2b0] sm:$0xff] }
  0x23   :  { %v32_v61 = vld [vmem:[%s3376_s2] sm:$0xff]  ;;  %220 = vmatpush.msra.mxu1 %v100_v60  ;;  %1569 = vmatmul.msk.f32.gmra.mxu2 %vm176_vm0, %v1860_v2  ;;  %v97_v15 = vld [vmem:[%s3376_s2 + $0x208] sm:$0xff]  ;;  %v147_v42 = vld [vmem:[%s3376_s2 + $0x398] sm:$0xff] }
  0x24   :  { %v1852_v0 = vld [vmem:[%s3377_s0] sm:$0xff]  ;;  %198 = vmatpush.msra.mxu0 %v32_v61  ;;  %286 = vmatpush.msrb.mxu2 %v113_v62  ;;  %v169_v22 = vld [vmem:[%s3376_s2 + $0x448] sm:$0xff]  ;;  %v62_v43 = vld [vmem:[%s3376_s2 + $0xf0] sm:$0xff] }
  0x25   :  { %v96_v1 = vld [vmem:[%s3376_s2 + $0x200] sm:$0xff]  ;;  %199 = vmatmul.f32.vlgmr.msra.gmra.mxu0 %v1852_v0  ;;  %344 = vmatpush.msrb.mxu3 %v158_v3  ;;  %v165_v26 = vld [vmem:[%s3376_s2 + $0x428] sm:$0xff]  ;;  %v87_v44 = vld [vmem:[%s3376_s2 + $0x1b8] sm:$0xff] }
  0x26   :  { %221 = vmatpush.msra.mxu1 %v96_v1  ;;  %287 = vmatpush.msrb.mxu2 %v109_v4  ;;  %v1922_v19 = vld [vmem:[%s3377_s0 + $0x20] sm:$0xff]  ;;  %v161_v31 = vld [vmem:[%s3376_s2 + $0x408] sm:$0xff]  ;;  %v114_v45 = vld [vmem:[%s3376_s2 + $0x290] sm:$0xff] }
  0x27   :  { %222 = vmatmul.f32.vlgmr.msra.gmra.mxu1 %v1871_v5  ;;  %345 = vmatpush.msrb.mxu3 %v154_v6  ;;  %v143_v46 = vld [vmem:[%s3376_s2 + $0x378] sm:$0xff]  ;;  %v58_v47 = vld [vmem:[%s3376_s2 + $0xd0] sm:$0xff] }
  0x28   :  { %321 = vmatpush.msrb.mxu1 %v94_v7  ;;  %288 = vmatpush.msrb.mxu2 %v105_v8  ;;  %v110_v49 = vld [vmem:[%s3376_s2 + $0x270] sm:$0xff]  ;;  %v139_v50 = vld [vmem:[%s3376_s2 + $0x358] sm:$0xff]  ;;  %v465_v8 = vld [vmem:[%s3378_s1] sm:$0xff] }
  0x29   :  { %268 = vmatmul.f32.vlgmr.msra.gmra.mxu3 %v1852_v0  ;;  %310 = vmatpush.msrb.mxu0 %v173_v12  ;;  %v54_v51 = vld [vmem:[%s3376_s2 + $0xb0] sm:$0xff]  ;;  %v83_v52 = vld [vmem:[%s3376_s2 + $0x198] sm:$0xff] }
  0x2a   :  { %346 = vmatpush.msrb.mxu3 %v150_v9  ;;  %322 = vmatpush.msrb.mxu1 %v90_v10  ;;  %v106_v53 = vld [vmem:[%s3376_s2 + $0x250] sm:$0xff]  ;;  %v135_v54 = vld [vmem:[%s3376_s2 + $0x338] sm:$0xff] }
  0x2b   :  { %289 = vmatpush.msrb.mxu2 %v101_v11  ;;  %311 = vmatpush.msrb.mxu0 %v169_v22  ;;  %v50_v55 = vld [vmem:[%s3376_s2 + $0x90] sm:$0xff]  ;;  %v79_v56 = vld [vmem:[%s3376_s2 + $0x178] sm:$0xff]  ;;  %v1610_v11 = vmov 0  }
  0x2c   :  { %347 = vmatpush.msrb.mxu3 %v146_v13  ;;  %323 = vmatpush.msrb.mxu1 %v86_v14  ;;  %v102_v57 = vld [vmem:[%s3376_s2 + $0x230] sm:$0xff]  ;;  %v131_v58 = vld [vmem:[%s3376_s2 + $0x318] sm:$0xff] }
  0x2d   :  { %290 = vmatpush.msrb.mxu2 %v97_v15  ;;  %202 = vmatmul.f32.gmra.mxu0 %v1911_v16  ;;  %v46_v59 = vld [vmem:[%s3376_s2 + $0x70] sm:$0xff]  ;;  %v75_v61 = vld [vmem:[%s3376_s2 + $0x158] sm:$0xff] }
  0x2e   :  { %348 = vmatpush.msrb.mxu3 %v142_v18  ;;  %291 = vmatmul.f32.vlgmr.msrb.gmra.mxu2 %v1871_v5  ;;  %v98_v60 = vld [vmem:[%s3376_s2 + $0x210] sm:$0xff]  ;;  %v127_v62 = vld [vmem:[%s3376_s2 + $0x2f8] sm:$0xff] }
  0x2f   :  { %379 = vmatpush.msra.mxu2 %v174_v17  ;;  %225 = vmatmul.f32.gmra.mxu1 %v1922_v19  ;;  %v42_v63 = vld [vmem:[%s3376_s2 + $0x50] sm:$0xff]  ;;  %v71_v1 = vld [vmem:[%s3376_s2 + $0x138] sm:$0xff] }
  0x30   :  { %349 = vmatpush.msrb.mxu3 %v138_v21  ;;  %324 = vmatpush.msrb.mxu1 %v82_v23  ;;  %v123_v3 = vld [vmem:[%s3376_s2 + $0x2d8] sm:$0xff]  ;;  %v38_v4 = vld [vmem:[%s3376_s2 + $0x30] sm:$0xff] }
  0x31   :  { %380 = vmatpush.msra.mxu2 %v170_v20  ;;  %312 = vmatpush.msrb.mxu0 %v165_v26  ;;  %v67_v6 = vld [vmem:[%s3376_s2 + $0x118] sm:$0xff]  ;;  %v34_v9 = vld [vmem:[%s3376_s2 + $0x10] sm:$0xff] }
  0x32   :  { %350 = vmatpush.msrb.mxu3 %v134_v25  ;;  %325 = vmatpush.msrb.mxu1 %v78_v27  ;;  %v119_v7 = vld [vmem:[%s3376_s2 + $0x2b8] sm:$0xff]  ;;  %v466_v25 = vld [vmem:[%s3378_s1 + $0x8] sm:$0xff] }
  0x33   :  { %381 = vmatpush.msra.mxu2 %v166_v24  ;;  %313 = vmatpush.msrb.mxu0 %v161_v31  ;;  %v63_v10 = vld [vmem:[%s3376_s2 + $0xf8] sm:$0xff] }
  0x34   :  { %351 = vmatpush.msrb.mxu3 %v130_v29  ;;  %326 = vmatpush.msrb.mxu1 %v74_v32  ;;  %v115_v12 = vld [vmem:[%s3376_s2 + $0x298] sm:$0xff] }
  0x35   :  { %382 = vmatpush.msra.mxu2 %v162_v28  ;;  %271 = vmatmul.f32.gmra.mxu3 %v1911_v16  ;;  %v59_v13 = vld [vmem:[%s3376_s2 + $0xd8] sm:$0xff] }
  0x36   :  { %1570 = vmatmul.msk.f32.vlgmr.msrb.gmra.mxu0 %vm176_vm0, %v1800_v48  ;;  %294 = vmatmul.f32.gmra.mxu2 %v1922_v19  ;;  %v111_v14 = vld [vmem:[%s3376_s2 + $0x278] sm:$0xff] }
  0x37   :  { %413 = vmatpush.msrb.mxu2 %v159_v30  ;;  %352 = vmatpush.msrb.mxu3 %v126_v33  ;;  %v175_v15 = vld [vmem:[%s3376_s2 + $0x478] sm:$0xff] }
  0x38   :  { %327 = vmatpush.msrb.mxu1 %v70_v35  ;;  %390 = vmatpush.msra.mxu0 %v95_v36  ;;  %v55_v17 = vld [vmem:[%s3376_s2 + $0xb8] sm:$0xff] }
  0x39   :  { %414 = vmatpush.msrb.mxu2 %v155_v34  ;;  %353 = vmatpush.msrb.mxu3 %v122_v37  ;;  %v107_v18 = vld [vmem:[%s3376_s2 + $0x258] sm:$0xff] }
  0x3a   :  { %328 = vmatpush.msrb.mxu1 %v66_v39  ;;  %391 = vmatpush.msra.mxu0 %v91_v40  ;;  %v171_v20 = vld [vmem:[%s3376_s2 + $0x458] sm:$0xff] }
  0x3b   :  { %415 = vmatpush.msrb.mxu2 %v151_v38  ;;  %354 = vmatpush.msrb.mxu3 %v118_v41  ;;  %v51_v21 = vld [vmem:[%s3376_s2 + $0x98] sm:$0xff] }
  0x3c   :  { %329 = vmatpush.msrb.mxu1 %v62_v43  ;;  %392 = vmatpush.msra.mxu0 %v87_v44  ;;  %v103_v22 = vld [vmem:[%s3376_s2 + $0x238] sm:$0xff] }
  0x3d   :  { %416 = vmatpush.msrb.mxu2 %v147_v42  ;;  %355 = vmatpush.msrb.mxu3 %v114_v45  ;;  %v167_v23 = vld [vmem:[%s3376_s2 + $0x438] sm:$0xff] }
  0x3e   :  { %1571 = vmatmul.msk.f32.gmra.mxu0 %vm176_vm0, %v1860_v2  ;;  %330 = vmatpush.msrb.mxu1 %v58_v47  ;;  %v47_v24 = vld [vmem:[%s3376_s2 + $0x78] sm:$0xff] }
  0x3f   :  { %417 = vmatpush.msrb.mxu2 %v143_v46  ;;  %356 = vmatpush.msrb.mxu3 %v110_v49  ;;  %v99_v26 = vld [vmem:[%s3376_s2 + $0x218] sm:$0xff] }
  0x40   :  { %331 = vmatpush.msrb.mxu1 %v54_v51  ;;  %393 = vmatpush.msra.mxu0 %v83_v52  ;;  %v43_v27 = vld [vmem:[%s3376_s2 + $0x58] sm:$0xff] }
  0x41   :  { %418 = vmatpush.msrb.mxu2 %v139_v50  ;;  %357 = vmatpush.msrb.mxu3 %v106_v53  ;;  %v163_v28 = vld [vmem:[%s3376_s2 + $0x418] sm:$0xff] }
  0x42   :  { %332 = vmatpush.msrb.mxu1 %v50_v55  ;;  %394 = vmatpush.msra.mxu0 %v79_v56  ;;  %v39_v29 = vld [vmem:[%s3376_s2 + $0x38] sm:$0xff] }
  0x43   :  { %419 = vmatpush.msrb.mxu2 %v135_v54  ;;  %358 = vmatpush.msrb.mxu3 %v102_v57  ;;  %v35_v30 = vld [vmem:[%s3376_s2 + $0x18] sm:$0xff] }
  0x44   :  { %1572 = vmatmul.msk.f32.vlgmr.msra.gmra.mxu2 %vm176_vm0, %v1800_v48  ;;  %333 = vmatpush.msrb.mxu1 %v46_v59 }
  0x45   :  { %420 = vmatpush.msrb.mxu2 %v131_v58  ;;  %359 = vmatpush.msrb.mxu3 %v98_v60 }
  0x46   :  { %395 = vmatpush.msra.mxu0 %v75_v61  ;;  %360 = vmatmul.f32.vlgmr.msrb.gmra.mxu3 %v1871_v5 }
  0x47   :  { %421 = vmatpush.msrb.mxu2 %v127_v62  ;;  %334 = vmatpush.msrb.mxu1 %v42_v63 }
  0x48   :  { %396 = vmatpush.msra.mxu0 %v71_v1  ;;  %1581 = vset.pattern.permute.xlu0 %v1610_v11 }
  0x49   :  { %422 = vmatpush.msrb.mxu2 %v123_v3  ;;  %335 = vmatpush.msrb.mxu1 %v38_v4 }
  0x4a   :  { %397 = vmatpush.msra.mxu0 %v67_v6  ;;  %469 = vperm.xlu0 %1581, %v465_v8  }
  0x4b   :  { %423 = vmatpush.msrb.mxu2 %v119_v7  ;;  %336 = vmatpush.msrb.mxu1 %v34_v9 }
  0x4c   :  { %398 = vmatpush.msra.mxu0 %v63_v10  ;;  %337 = vmatmul.f32.vlgmr.msrb.gmra.mxu1 %v1852_v0 }
  0x4d   :  { %424 = vmatpush.msrb.mxu2 %v115_v12  ;;  %448 = vmatpush.msra.mxu1 %v175_v15 }
  0x4e   :  { %1573 = vmatmul.msk.f32.gmra.mxu2 %vm176_vm0, %v1860_v2  ;;  %399 = vmatpush.msra.mxu0 %v59_v13  ;;  %v2158_v13 = vld [vmem:[%s3379_s3 + $0x10] sm:$0xff] }
  0x4f   :  { %425 = vmatpush.msrb.mxu2 %v111_v14  ;;  %363 = vmatmul.f32.gmra.mxu3 %v1922_v19  ;;  %v2163_v14 = vld [vmem:[%s3379_s3] sm:$0xff] }
  0x50   :  { %400 = vmatpush.msra.mxu0 %v55_v17  ;;  %449 = vmatpush.msra.mxu1 %v171_v20 }
  0x51   :  { %426 = vmatpush.msrb.mxu2 %v107_v18 }
  0x52   :  { %401 = vmatpush.msra.mxu0 %v51_v21  ;;  %450 = vmatpush.msra.mxu1 %v167_v23  ;;  %v2181_v23 = vld [vmem:[%s3379_s3 + $0x90] sm:$0xff] }
  0x53   :  { %427 = vmatpush.msrb.mxu2 %v103_v22  ;;  %474 = vperm.xlu0 %1581, %v466_v25   ;;  %v487_v22 = vld [vmem:[%s3379_s3 + $0x30] sm:$0xff] }
  0x54   :  { %402 = vmatpush.msra.mxu0 %v47_v24  ;;  %340 = vmatmul.f32.gmra.mxu1 %v1911_v16 }
  0x55   :  { %428 = vmatpush.msrb.mxu2 %v99_v26  ;;  %451 = vmatpush.msra.mxu1 %v163_v28  ;;  %v489_v28 = vld [vmem:[%s3379_s3 + $0x40] sm:$0xff] }
  0x56   :  { %429 = vmatmul.f32.vlgmr.msrb.gmra.mxu2 %v1871_v5  ;;  %403 = vmatpush.msra.mxu0 %v43_v27 }
  0x58   :  { %404 = vmatpush.msra.mxu0 %v39_v29  ;;  %v2194_v29 = vld [vmem:[%s3379_s3 + $0xc0] sm:$0xff] }
  0x5a   :  { %405 = vmatpush.msra.mxu0 %v35_v30 }
  0x5b   :  { %406 = vmatmul.f32.vlgmr.msra.gmra.mxu0 %v1852_v0 }
  0x5c   :  { %1574 = vmatmul.msk.f32.vlgmr.msra.gmra.mxu1 %vm176_vm0, %v1800_v48 }
  0x5e   :  { %432 = vmatmul.f32.gmra.mxu2 %v1922_v19 }
  0x63   :  { %409 = vmatmul.f32.gmra.mxu0 %v1911_v16 }
  0x64   :  { %1575 = vmatmul.msk.f32.gmra.mxu1 %vm176_vm0, %v1860_v2 }
  0x90   :  { %v246_v5 = vpop.f32.mrf.mxu2 }
  0xa2   :  { %v200_v31 = vpop.f32.mrf.mxu0 }
  0xa4   :  { %v223_v32 = vpop.f32.mrf.mxu1 }
  0xa5   :  { %v224_v52 = vadd.f32 %v223_v32, %v200_v31 }
  0xa6   :  { %v249_v33 = vpop.f32.mrf.mxu2 }
  0xa7   :  { %v247_v59 = vadd.f32 %v246_v5, %v224_v52  ;;  %v2258_v52 = vld [vmem:[%s3379_s3 + $0x1c0] sm:$0xff] }
  0xaa   :  { %v203_v34 = vpop.f32.mrf.mxu0 }
  0xac   :  { %v226_v35 = vpop.f32.mrf.mxu1  ;;  %v269_v38 = vpop.f32.mrf.mxu3 }
  0xad   :  { %v227_v36 = vadd.f32 %v226_v35, %v203_v34  ;;  %v511_v34 = vld [vmem:[%s3379_s3 + $0xf0] sm:$0xff] }
  0xaf   :  { %v250_v37 = vadd.f32 %v249_v33, %v227_v36  ;;  %v491_v33 = vld [vmem:[%s3379_s3 + $0x50] sm:$0xff] }
  0xb1   :  { %v292_v0 = vpop.f32.mrf.mxu2 }
  0xb2   :  { %v293_v50 = vadd.f32 %v292_v0, %v269_v38  ;;  %v493_v0 = vld [vmem:[%s3379_s3 + $0x60] sm:$0xff] }
  0xb3   :  { %v315_v39 = vpop.f32.mrf.mxu0 }
  0xb4   :  { %v316_v56 = vadd.f32 %v315_v39, %v293_v50  ;;  %v2217_v39 = vld [vmem:[%s3379_s3 + $0x120] sm:$0xff] }
  0xb5   :  { %v2248_v50 = vld [vmem:[%s3379_s3 + $0xa0] sm:$0xff] }
  0xb6   :  { %v459_v62 = vmax.f32 %v247_v59, %v316_v56  ;;  %v2272_v59 = vld [vmem:[%s3379_s3 + $0xd0] sm:$0xff] }
  0xb8   :  { %v272_v40 = vpop.f32.mrf.mxu3 }
  0xb9   :  { %v295_v48 = vpop.f32.mrf.mxu2 }
  0xba   :  { %v296_v41 = vadd.f32 %v295_v48, %v272_v40 }
  0xbb   :  { %v318_v19 = vpop.f32.mrf.mxu0 }
  0xbc   :  { %v319_v42 = vadd.f32 %v318_v19, %v296_v41  ;;  %v470_v4 = vpop.permute.xlu0 %469 }
  0xbe   :  { %v460_v16 = vmax.f32 %v250_v37, %v319_v42  ;;  %v2227_v42 = vld [vmem:[%s3379_s3 + $0x20] sm:$0xff] }
  0xc7   :  { %v384_v43 = vpop.f32.mrf.mxu2 }
  0xc9   :  { %v338_v44 = vpop.f32.mrf.mxu1  ;;  %v361_v2 = vpop.f32.mrf.mxu3 }
  0xca   :  { %v362_v53 = vadd.f32 %v361_v2, %v338_v44 }
  0xcc   :  { %v385_v60 = vadd.f32 %v384_v43, %v362_v53  ;;  %v2235_v43 = vld [vmem:[%s3379_s3 + $0x180] sm:$0xff] }
  0xd1   :  { %v387_v45 = vpop.f32.mrf.mxu2  ;;  %v341_v46 = vpop.f32.mrf.mxu1 }
  0xd2   :  { %v364_v47 = vpop.f32.mrf.mxu3 }
  0xd3   :  { %v365_v49 = vadd.f32 %v364_v47, %v341_v46 }
  0xd5   :  { %v388_v51 = vadd.f32 %v387_v45, %v365_v49 }
  0xd8   :  { %v407_v54 = vpop.f32.mrf.mxu0 }
  0xd9   :  { %v430_v55 = vpop.f32.mrf.mxu2  ;;  %v453_v58 = vpop.f32.mrf.mxu1 }
  0xda   :  { %v431_v57 = vadd.f32 %v430_v55, %v407_v54 }
  0xdc   :  { %v454_v61 = vadd.f32 %v453_v58, %v431_v57 }
  0xde   :  { %v461_v63 = vmax.f32 %v385_v60, %v454_v61  ;;  %v2277_v60 = vld [vmem:[%s3379_s3 + $0xb0] sm:$0xff]  ;;  %v2282_v61 = vld [vmem:[%s3379_s3 + $0x160] sm:$0xff] }
  0xe0   :  { %v463_v1 = vmax.f32 %v459_v62, %v461_v63  ;;  %v410_v3 = vpop.f32.mrf.mxu0 }
  0xe1   :  { %v433_v6 = vpop.f32.mrf.mxu2  ;;  %v456_v9 = vpop.f32.mrf.mxu1 }
  0xe2   :  { %v477_v7 = vadd.f32 %v470_v4, %v463_v1  ;;  %v434_v8 = vadd.f32 %v433_v6, %v410_v3 }
  0xe4   :  { %1582 = vtanh.f32 %v477_v7  ;;  %v457_v10 = vadd.f32 %v456_v9, %v434_v8  ;;  %v2296_v7 = vld [vmem:[%s3379_s3 + $0x100] sm:$0xff] }
  0xe5   :  { %v2301_v8 = vld [vmem:[%s3379_s3 + $0xe0] sm:$0xff] }
  0xe6   :  { %v462_v11 = vmax.f32 %v388_v51, %v457_v10  ;;  %v2253_v51 = vld [vmem:[%s3379_s3 + $0x80] sm:$0xff] }
  0xe8   :  { %v2153_v12 = vmax.f32 %v460_v16, %v462_v11  ;;  %v495_v16 = vld [vmem:[%s3379_s3 + $0x70] sm:$0xff] }
  0xea   :  { %v2165_v15 = vpop.eup %1582 }
  0xeb   :  { %1059 = vrot.lane.b32.xlu0 %v2165_v15, %s1611_s25  ;;  %v548_v17 = vmul.f32 %v2165_v15, %v2158_v13  ;;  %v546_v18 = vmul.f32 %v2165_v15, %v2163_v14  ;;  %v552_v24 = vmul.f32 %v2165_v15, %v487_v22  ;;  %v564_v25 = vmul.f32 %v2165_v15, %v2181_v23 }
  0xec   :  { %v554_v30 = vmul.f32 %v2165_v15, %v489_v28  ;;  %v570_v5 = vmul.f32 %v2165_v15, %v2194_v29  ;;  %v556_v35 = vmul.f32 %v2165_v15, %v491_v33  ;;  %v576_v36 = vmul.f32 %v2165_v15, %v511_v34  ;;  %v2329_v28 = vld [vmem:[%s3379_s3 + $0x1a0] sm:$0xff]  ;;  %v2345_v33 = vld [vmem:[%s3379_s3 + $0x1b0] sm:$0xff] }
  0xed   :  { %v617_v20 = vsel %vm610_vm1, %v548_v17, 0.0  ;;  %v611_v21 = vsel %vm610_vm1, %v546_v18, 0.0  ;;  %v629_v26 = vsel %vm610_vm1, %v552_v24, 0.0  ;;  %v665_v27 = vsel %vm610_vm1, %v564_v25, 0.0  ;;  %v2312_v18 = vld [vmem:[%s3379_s3 + $0x140] sm:$0xff]  ;;  %v475_v24 = vpop.permute.xlu0 %474 }
  0xee   :  { %618 = vadd.xlane.f32.xlu2 %v617_v20  ;;  %612 = vadd.xlane.f32.xlu1 %v611_v21  ;;  %v635_v31 = vsel %vm610_vm1, %v554_v30, 0.0  ;;  %v683_v32 = vsel %vm610_vm1, %v570_v5, 0.0  ;;  %v641_v37 = vsel %vm610_vm1, %v556_v35, 0.0  ;;  %v701_v38 = vsel %vm610_vm1, %v576_v36, 0.0  ;;  %v2317_v20 = vld [vmem:[%s3379_s3 + $0x110] sm:$0xff] }
  0xef   :  { %v558_v40 = vmul.f32 %v2165_v15, %v493_v0  ;;  %v582_v48 = vmul.f32 %v2165_v15, %v2217_v39  ;;  %v550_v44 = vmul.f32 %v2165_v15, %v2227_v42  ;;  %v560_v2 = vmul.f32 %v2165_v15, %v495_v16  ;;  %v2334_v30 = vld [vmem:[%s3379_s3 + $0x130] sm:$0xff] }
  0xf0   :  { %v594_v45 = vmul.f32 %v2165_v15, %v2235_v43  ;;  %v566_v53 = vmul.f32 %v2165_v15, %v2248_v50  ;;  %v562_v54 = vmul.f32 %v2165_v15, %v2253_v51  ;;  %v602_v55 = vmul.f32 %v2165_v15, %v2258_v52  ;;  %v2352_v35 = vld [vmem:[%s3379_s3 + $0x150] sm:$0xff] }
  0xf1   :  { %v647_v41 = vsel %vm610_vm1, %v558_v40, 0.0  ;;  %v719_v19 = vsel %vm610_vm1, %v582_v48, 0.0  ;;  %v623_v46 = vsel %vm610_vm1, %v550_v44, 0.0  ;;  %v653_v47 = vsel %vm610_vm1, %v560_v2, 0.0  ;;  %v2365_v40 = vld [vmem:[%s3379_s3 + $0x1e0] sm:$0xff]  ;;  %v2370_v48 = vld [vmem:[%s3379_s3 + $0x190] sm:$0xff] }
  0xf2   :  { %v755_v49 = vsel %vm610_vm1, %v594_v45, 0.0  ;;  %v671_v56 = vsel %vm610_vm1, %v566_v53, 0.0  ;;  %v659_v57 = vsel %vm610_vm1, %v562_v54, 0.0  ;;  %v779_v58 = vsel %vm610_vm1, %v602_v55, 0.0  ;;  %v2381_v2 = vld [vmem:[%s3379_s3 + $0x1f0] sm:$0xff]  ;;  %v2397_v54 = vld [vmem:[%s3379_s3 + $0x88] sm:$0xff] }
  0xf3   :  { %v572_v62 = vmul.f32 %v2165_v15, %v2272_v59  ;;  %v568_v63 = vmul.f32 %v2165_v15, %v2277_v60  ;;  %v590_v1 = vmul.f32 %v2165_v15, %v2282_v61  ;;  %v578_v9 = vmul.f32 %v2165_v15, %v2296_v7  ;;  %v2386_v45 = vld [vmem:[%s3379_s3 + $0x1d0] sm:$0xff]  ;;  %3401 = vst [vmem:[#allocation2_spill] sm:$0xff] %v2397_v54 }
  0xf4   :  { %v574_v10 = vmul.f32 %v2165_v15, %v2301_v8  ;;  %v586_v21 = vmul.f32 %v2165_v15, %v2312_v18  ;;  %v580_v22 = vmul.f32 %v2165_v15, %v2317_v20  ;;  %v478_v25 = vadd.f32 %v475_v24, %v2153_v12  ;;  %v527_v55 = vld [vmem:[%s3379_s3 + $0x170] sm:$0xff] }
  0xf5   :  { %v689_v3 = vsel %vm610_vm1, %v572_v62, 0.0  ;;  %v677_v4 = vsel %vm610_vm1, %v568_v63, 0.0  ;;  %v743_v6 = vsel %vm610_vm1, %v590_v1, 0.0  ;;  %v707_v11 = vsel %vm610_vm1, %v578_v9, 0.0  ;;  %v2410_v63 = vld [vmem:[%s3379_s3 + $0xb8] sm:$0xff] }
  0xf6   :  { %630 = vadd.xlane.f32.xlu2 %v629_v26  ;;  %666 = vadd.xlane.f32.xlu1 %v665_v27  ;;  %v695_v17 = vsel %vm610_vm1, %v574_v10, 0.0  ;;  %v731_v26 = vsel %vm610_vm1, %v586_v21, 0.0  ;;  %v713_v27 = vsel %vm610_vm1, %v580_v22, 0.0  ;;  %1584 = vtanh.f32 %v478_v25  ;;  %3402 = vst [vmem:[#allocation3_spill] sm:$0xff] %v2410_v63  ;;  %v2415_v1 = vld [vmem:[%s3379_s3 + $0x18] sm:$0xff] }
  0xf7   :  { %v598_v12 = vmul.f32 %v2165_v15, %v2329_v28  ;;  %v584_v5 = vmul.f32 %v2165_v15, %v2334_v30  ;;  %v600_v36 = vmul.f32 %v2165_v15, %v2345_v33  ;;  %v2438_v21 = vld [vmem:[%s3379_s3 + $0x98] sm:$0xff] }
  0xf8   :  { %3404 = vst [vmem:[#allocation5_spill] sm:$0xff] %v2438_v21 }
  0xfc   :  { %v2347_v34 = vpop.eup %1584 }
  0xfe   :  { %636 = vadd.xlane.f32.xlu2 %v635_v31  ;;  %684 = vadd.xlane.f32.xlu1 %v683_v32  ;;  %v767_v31 = vsel %vm610_vm1, %v598_v12, 0.0  ;;  %v725_v32 = vsel %vm610_vm1, %v584_v5, 0.0 }
 0x106   :  { %642 = vadd.xlane.f32.xlu2 %v641_v37  ;;  %702 = vadd.xlane.f32.xlu1 %v701_v38  ;;  %v588_v37 = vmul.f32 %v2165_v15, %v2352_v35  ;;  %v773_v38 = vsel %vm610_vm1, %v600_v36, 0.0  ;;  %v2463_v36 = vld [vmem:[%s3379_s3 + $0xc8] sm:$0xff] }
 0x107   :  { %3406 = vst [vmem:[#allocation7_spill] sm:$0xff] %v2463_v36 }
 0x108   :  { %v737_v0 = vsel %vm610_vm1, %v588_v37, 0.0 }
 0x10e   :  { %648 = vadd.xlane.f32.xlu2 %v647_v41  ;;  %720 = vadd.xlane.f32.xlu1 %v719_v19  ;;  %v606_v41 = vmul.f32 %v2165_v15, %v2365_v40  ;;  %v596_v19 = vmul.f32 %v2165_v15, %v2370_v48 }
 0x110   :  { %v791_v16 = vsel %vm610_vm1, %v606_v41, 0.0  ;;  %v761_v44 = vsel %vm610_vm1, %v596_v19, 0.0  ;;  %v571_v41 = vmul.f32 %v2347_v34, %v2463_v36  ;;  %v2475_v19 = vld [vmem:[%s3379_s3 + $0x38] sm:$0xff] }
 0x111   :  { %3407 = vst [vmem:[#allocation8_spill] sm:$0xff] %v2475_v19 }
 0x115   :  { %624 = vadd.xlane.f32.xlu0 %v623_v46  ;;  %v608_v46 = vmul.f32 %v2165_v15, %v2381_v2 }
 0x116   :  { %654 = vadd.xlane.f32.xlu2 %v653_v47  ;;  %756 = vadd.xlane.f32.xlu1 %v755_v49  ;;  %v604_v47 = vmul.f32 %v2165_v15, %v2386_v45 }
 0x117   :  { %v797_v49 = vsel %vm610_vm1, %v608_v46, 0.0  ;;  %v686_v46 = vsel %vm610_vm1, %v571_v41, 0.0 }
 0x118   :  { %v785_v53 = vsel %vm610_vm1, %v604_v47, 0.0  ;;  %v2484_v47 = vld [vmem:[%s3379_s3 + $0x1c8] sm:$0xff] }
 0x11d   :  { %672 = vadd.xlane.f32.xlu0 %v671_v56  ;;  %v563_v56 = vmul.f32 %v2347_v34, %v2397_v54 }
 0x11e   :  { %660 = vadd.xlane.f32.xlu2 %v659_v57  ;;  %780 = vadd.xlane.f32.xlu1 %v779_v58  ;;  %v592_v57 = vmul.f32 %v2165_v15, %v527_v55 }
 0x11f   :  { %v662_v58 = vsel %vm610_vm1, %v563_v56, 0.0  ;;  %v603_v56 = vmul.f32 %v2347_v34, %v2484_v47 }
 0x120   :  { %v749_v62 = vsel %vm610_vm1, %v592_v57, 0.0 }
 0x125   :  { %690 = vadd.xlane.f32.xlu0 %v689_v3  ;;  %v569_v3 = vmul.f32 %v2347_v34, %v2410_v63 }
 0x126   :  { %678 = vadd.xlane.f32.xlu2 %v677_v4  ;;  %744 = vadd.xlane.f32.xlu1 %v743_v6  ;;  %v549_v4 = vmul.f32 %v2347_v34, %v2415_v1  ;;  %v2426_v6 = vld [vmem:[%s3379_s3 + $0x8] sm:$0xff] }
 0x127   :  { %3403 = vst [vmem:[#allocation4_spill] sm:$0xff] %v2426_v6  ;;  %v680_v9 = vsel %vm610_vm1, %v569_v3, 0.0  ;;  %v547_v10 = vmul.f32 %v2347_v34, %v2426_v6  ;;  %v782_v3 = vsel %vm610_vm1, %v603_v56, 0.0 }
 0x129   :  { %v614_v22 = vsel %vm610_vm1, %v547_v10, 0.0  ;;  %v2512_v10 = vld [vmem:[%s3379_s3 + $0x168] sm:$0xff] }
 0x12d   :  { %708 = vadd.xlane.f32.xlu0 %v707_v11  ;;  %v620_v11 = vsel %vm610_vm1, %v549_v4, 0.0 }
 0x12e   :  { %696 = vadd.xlane.f32.xlu2 %v695_v17  ;;  %v510_v17 = vld [vmem:[%s3379_s3 + $0xe8] sm:$0xff] }
 0x12f   :  { %v575_v24 = vmul.f32 %v2347_v34, %v510_v17 }
 0x131   :  { %v698_v12 = vsel %vm610_vm1, %v575_v24, 0.0  ;;  %v591_v24 = vmul.f32 %v2347_v34, %v2512_v10 }
 0x135   :  { %732 = vadd.xlane.f32.xlu0 %v731_v26  ;;  %v565_v26 = vmul.f32 %v2347_v34, %v2438_v21 }
 0x136   :  { %714 = vadd.xlane.f32.xlu2 %v713_v27  ;;  %v2449_v27 = vld [vmem:[%s3379_s3 + $0x28] sm:$0xff] }
 0x137   :  { %3405 = vst [vmem:[#allocation6_spill] sm:$0xff] %v2449_v27  ;;  %v551_v5 = vmul.f32 %v2347_v34, %v2449_v27 }
 0x139   :  { %v626_v37 = vsel %vm610_vm1, %v551_v5, 0.0 }
 0x13d   :  { %768 = vadd.xlane.f32.xlu0 %v767_v31  ;;  %v668_v31 = vsel %vm610_vm1, %v565_v26, 0.0 }
 0x13e   :  { %726 = vadd.xlane.f32.xlu2 %v725_v32  ;;  %v2458_v32 = vld [vmem:[%s3379_s3 + $0x118] sm:$0xff] }
 0x13f   :  { %1061 = vrot.lane.b32.xlu1 %v2347_v34, %s1611_s25 }
 0x145   :  { %774 = vadd.xlane.f32.xlu0 %v773_v38  ;;  %v581_v38 = vmul.f32 %v2347_v34, %v2458_v32 }
 0x146   :  { %738 = vadd.xlane.f32.xlu2 %v737_v0 }
 0x14d   :  { %792 = vadd.xlane.f32.xlu0 %v791_v16  ;;  %v716_v16 = vsel %vm610_vm1, %v581_v38, 0.0 }
 0x14e   :  { %762 = vadd.xlane.f32.xlu2 %v761_v44  ;;  %v553_v44 = vmul.f32 %v2347_v34, %v2475_v19 }
 0x150   :  { %v632_v55 = vsel %vm610_vm1, %v553_v44, 0.0 }
 0x155   :  { %798 = vadd.xlane.f32.xlu0 %v797_v49  ;;  %v2489_v49 = vld [vmem:[%s3379_s3 + $0xf8] sm:$0xff] }
 0x156   :  { %786 = vadd.xlane.f32.xlu2 %v785_v53  ;;  %3408 = vst [vmem:[#allocation9_spill] sm:$0xff] %v2489_v49 }
 0x15d   :  { %663 = vadd.xlane.f32.xlu0 %v662_v58  ;;  %v577_v58 = vmul.f32 %v2347_v34, %v2489_v49  ;;  %v2519_v17 = vpop.permute.xlu0 %1059 }
 0x15e   :  { %750 = vadd.xlane.f32.xlu2 %v749_v62  ;;  %v2503_v62 = vld [vmem:[%s3379_s3 + $0x48] sm:$0xff]  ;;  %v1085_v6 = vmul.f32 %v2519_v17, %v2248_v50  ;;  %v1107_v54 = vmul.f32 %v2519_v17, %v2352_v35 }
 0x15f   :  { %3409 = vst [vmem:[#allocation10_spill] sm:$0xff] %v2503_v62  ;;  %v555_v4 = vmul.f32 %v2347_v34, %v2503_v62 }
 0x161   :  { %v2419_v15 = vpop.xlane.xlu2 %618  ;;  %v2491_v53 = vpop.xlane.xlu1 %612 }
 0x165   :  { %681 = vadd.xlane.f32.xlu0 %v680_v9  ;;  %v704_v9 = vsel %vm610_vm1, %v577_v58, 0.0 }
 0x166   :  { %621 = vadd.xlane.f32.xlu2 %v620_v11  ;;  %v2517_v11 = vld [vmem:[%s3379_s3 + $0x128] sm:$0xff] }
 0x167   :  { %v583_v5 = vmul.f32 %v2347_v34, %v2517_v11 }
 0x169   :  { %v2442_v25 = vpop.xlane.xlu2 %630  ;;  %615 = vadd.xlane.f32.xlu1 %v614_v22  ;;  %v638_v22 = vsel %vm610_vm1, %v555_v4, 0.0  ;;  %v2524_v26 = vpop.xlane.xlu1 %666  ;;  %v722_v41 = vsel %vm610_vm1, %v583_v5, 0.0 }
 0x16d   :  { %699 = vadd.xlane.f32.xlu0 %v698_v12 }
 0x16e   :  { %669 = vadd.xlane.f32.xlu2 %v668_v31  ;;  %v2533_v31 = vld [vmem:[%s3379_s3 + $0x58] sm:$0xff] }
 0x16f   :  { %3410 = vst [vmem:[#allocation11_spill] sm:$0xff] %v2533_v31  ;;  %v557_v38 = vmul.f32 %v2347_v34, %v2533_v31  ;;  %v1065_v31 = vmul.f32 %v2519_v17, %v2163_v14 }
 0x171   :  { %v2468_v0 = vpop.xlane.xlu2 %636  ;;  %627 = vadd.xlane.f32.xlu1 %v626_v37  ;;  %v746_v37 = vsel %vm610_vm1, %v591_v24, 0.0  ;;  %v2558_v4 = vpop.xlane.xlu1 %684  ;;  %v2567_v24 = vld [vmem:[%s3379_s3 + $0x148] sm:$0xff] }
 0x175   :  { %717 = vadd.xlane.f32.xlu0 %v716_v16  ;;  %v2542_v16 = vld [vmem:[%s3379_s3 + $0x138] sm:$0xff] }
 0x176   :  { %687 = vadd.xlane.f32.xlu2 %v686_v46  ;;  %v644_v46 = vsel %vm610_vm1, %v557_v38, 0.0  ;;  %v585_v58 = vmul.f32 %v2347_v34, %v2542_v16  ;;  %v1097_v38 = vmul.f32 %v2519_v17, %v2296_v7 }
 0x179   :  { %v2496_v57 = vpop.xlane.xlu2 %642  ;;  %633 = vadd.xlane.f32.xlu1 %v632_v55  ;;  %v1113_v55 = vmul.f32 %v2519_v17, %v2235_v43  ;;  %v728_v43 = vsel %vm610_vm1, %v585_v58, 0.0  ;;  %v1225_v58 = vsel %vm610_vm1, %v1097_v38, 0.0  ;;  %v1101_v38 = vmul.f32 %v2519_v17, %v2217_v39  ;;  %v2615_v39 = vld [vmem:[%s3379_s3 + $0x198] sm:$0xff] }
 0x17d   :  { %783 = vadd.xlane.f32.xlu0 %v782_v3  ;;  %v2556_v3 = vld [vmem:[%s3379_s3 + $0x68] sm:$0xff] }
 0x17e   :  { %705 = vadd.xlane.f32.xlu2 %v704_v9  ;;  %3411 = vst [vmem:[#allocation12_spill] sm:$0xff] %v2556_v3  ;;  %v1273_v9 = vsel %vm610_vm1, %v1113_v55, 0.0  ;;  %v2581_v55 = vld [vmem:[%s3379_s3 + $0x78] sm:$0xff] }
 0x17f   :  { %3412 = vst [vmem:[#allocation13_spill] sm:$0xff] %v2581_v55 }
 0x181   :  { %v2526_v12 = vpop.xlane.xlu2 %648  ;;  %639 = vadd.xlane.f32.xlu1 %v638_v22  ;;  %v559_v22 = vmul.f32 %v2347_v34, %v2556_v3 }
 0x185   :  { %747 = vadd.xlane.f32.xlu0 %v746_v37  ;;  %v650_v37 = vsel %vm610_vm1, %v559_v22, 0.0  ;;  %v2586_v22 = vpop.xlane.xlu1 %702 }
 0x186   :  { %723 = vadd.xlane.f32.xlu2 %v722_v41 }
 0x188   :  { %v2544_v44 = vpop.xlane.xlu0 %624 }
 0x189   :  { %v2549_v56 = vpop.xlane.xlu2 %654  ;;  %645 = vadd.xlane.f32.xlu1 %v644_v46  ;;  %v587_v46 = vmul.f32 %v2347_v34, %v2567_v24 }
 0x18b   :  { %v734_v7 = vsel %vm610_vm1, %v587_v46, 0.0  ;;  %v2606_v46 = vld [vmem:[%s3379_s3 + $0xa8] sm:$0xff] }
 0x18c   :  { %3414 = vst [vmem:[#allocation15_spill] sm:$0xff] %v2606_v46  ;;  %v567_v62 = vmul.f32 %v2347_v34, %v2606_v46 }
 0x18d   :  { %1274 = vadd.xlane.f32.xlu0 %v1273_v9  ;;  %v561_v9 = vmul.f32 %v2347_v34, %v2581_v55 }
 0x18e   :  { %729 = vadd.xlane.f32.xlu2 %v728_v43  ;;  %v2592_v43 = vld [vmem:[%s3379_s3 + $0x188] sm:$0xff]  ;;  %v674_v27 = vsel %vm610_vm1, %v567_v62, 0.0 }
 0x18f   :  { %v656_v3 = vsel %vm610_vm1, %v561_v9, 0.0 }
 0x190   :  { %v2569_v5 = vpop.xlane.xlu0 %672 }
 0x191   :  { %v2574_v41 = vpop.xlane.xlu2 %660  ;;  %651 = vadd.xlane.f32.xlu1 %v650_v37 }
 0x195   :  { %1226 = vadd.xlane.f32.xlu0 %v1225_v58  ;;  %v595_v58 = vmul.f32 %v2347_v34, %v2592_v43 }
 0x196   :  { %735 = vadd.xlane.f32.xlu2 %v734_v7  ;;  %v1237_v7 = vsel %vm610_vm1, %v1101_v38, 0.0  ;;  %v1083_v38 = vmul.f32 %v2519_v17, %v2181_v23  ;;  %v2640_v23 = vld [vmem:[%s3379_s3 + $0x1a8] sm:$0xff] }
 0x197   :  { %v758_v9 = vsel %vm610_vm1, %v595_v58, 0.0  ;;  %v597_v58 = vmul.f32 %v2347_v34, %v2615_v39 }
 0x198   :  { %v2594_v37 = vpop.xlane.xlu0 %690 }
 0x199   :  { %3413 = vst [vmem:[#allocation14_spill] sm:$0xff] %v2594_v37  ;;  %v2599_v49 = vpop.xlane.xlu2 %678  ;;  %657 = vadd.xlane.f32.xlu1 %v656_v3  ;;  %v2617_v3 = vpop.xlane.xlu1 %720  ;;  %v764_v62 = vsel %vm610_vm1, %v597_v58, 0.0  ;;  %v599_v58 = vmul.f32 %v2347_v34, %v2640_v23 }
 0x19b   :  { %v770_v50 = vsel %vm610_vm1, %v599_v58, 0.0  ;;  %v2679_v58 = vld [vmem:[%s3379_s3 + $0x1d8] sm:$0xff] }
 0x19c   :  { %3419 = vst [vmem:[#allocation20_spill] sm:$0xff] %v2679_v58 }
 0x19d   :  { %1238 = vadd.xlane.f32.xlu0 %v1237_v7  ;;  %v2631_v7 = vld [vmem:[%s3379_s3 + $0xd8] sm:$0xff] }
 0x19e   :  { %759 = vadd.xlane.f32.xlu2 %v758_v9  ;;  %3417 = vst [vmem:[#allocation18_spill] sm:$0xff] %v2631_v7  ;;  %v1183_v9 = vsel %vm610_vm1, %v1083_v38, 0.0  ;;  %v573_v63 = vmul.f32 %v2347_v34, %v2631_v7 }
 0x1a0   :  { %v2619_v19 = vpop.xlane.xlu0 %708  ;;  %v692_v55 = vsel %vm610_vm1, %v573_v63, 0.0 }
 0x1a1   :  { %3415 = vst [vmem:[#allocation16_spill] sm:$0xff] %v2619_v19  ;;  %v2624_v36 = vpop.xlane.xlu2 %696  ;;  %675 = vadd.xlane.f32.xlu1 %v674_v27  ;;  %v2647_v38 = vpop.xlane.xlu1 %756 }
 0x1a2   :  { %3416 = vst [vmem:[#allocation17_spill] sm:$0xff] %v2624_v36 }
 0x1a5   :  { %1184 = vadd.xlane.f32.xlu0 %v1183_v9  ;;  %v2656_v9 = vld [vmem:[%s3379_s3 + $0x108] sm:$0xff] }
 0x1a6   :  { %765 = vadd.xlane.f32.xlu2 %v764_v62  ;;  %v1189_v62 = vsel %vm610_vm1, %v1085_v6, 0.0  ;;  %v579_v63 = vmul.f32 %v2347_v34, %v2656_v9 }
 0x1a8   :  { %v2642_v27 = vpop.xlane.xlu0 %732  ;;  %v710_v46 = vsel %vm610_vm1, %v579_v63, 0.0  ;;  %v605_v63 = vmul.f32 %v2347_v34, %v2679_v58 }
 0x1a9   :  { %v2649_v19 = vpop.xlane.xlu2 %714  ;;  %693 = vadd.xlane.f32.xlu1 %v692_v55  ;;  %v2665_v55 = vld [vmem:[%s3379_s3 + $0x1b8] sm:$0xff] }
 0x1aa   :  { %v788_v37 = vsel %vm610_vm1, %v605_v63, 0.0 }
 0x1ad   :  { %1190 = vadd.xlane.f32.xlu0 %v1189_v62  ;;  %v601_v62 = vmul.f32 %v2347_v34, %v2665_v55 }
 0x1ae   :  { %771 = vadd.xlane.f32.xlu2 %v770_v50  ;;  %v2681_v50 = vpop.xlane.xlu1 %780 }
 0x1af   :  { %v776_v14 = vsel %vm610_vm1, %v601_v62, 0.0  ;;  %v2704_v62 = vld [vmem:[%s3379_s3 + $0x158] sm:$0xff] }
 0x1b0   :  { %v2667_v7 = vpop.xlane.xlu0 %768  ;;  %3423 = vst [vmem:[#allocation24_spill] sm:$0xff] %v2704_v62 }
 0x1b1   :  { %3418 = vst [vmem:[#allocation19_spill] sm:$0xff] %v2667_v7  ;;  %v2672_v6 = vpop.xlane.xlu2 %726  ;;  %711 = vadd.xlane.f32.xlu1 %v710_v46  ;;  %v1129_v7 = vsel %vm610_vm1, %v1065_v31, 0.0  ;;  %v2690_v46 = vld [vmem:[%s3379_s3 + $0x1e8] sm:$0xff] }
 0x1b2   :  { %3420 = vst [vmem:[#allocation21_spill] sm:$0xff] %v2690_v46 }
 0x1b5   :  { %1130 = vadd.xlane.f32.xlu0 %v1129_v7  ;;  %v607_v7 = vmul.f32 %v2347_v34, %v2690_v46 }
 0x1b6   :  { %777 = vadd.xlane.f32.xlu2 %v776_v14  ;;  %v1255_v14 = vsel %vm610_vm1, %v1107_v54, 0.0  ;;  %v2709_v63 = vpop.xlane.xlu1 %744  ;;  %v1089_v54 = vmul.f32 %v2519_v17, %v2194_v29 }
 0x1b7   :  { %v794_v35 = vsel %vm610_vm1, %v607_v7, 0.0  ;;  %v2729_v7 = vld [vmem:[%s3379_s3 + $0x178] sm:$0xff] }
 0x1b8   :  { %v2692_v36 = vpop.xlane.xlu0 %774 }
 0x1b9   :  { %3421 = vst [vmem:[#allocation22_spill] sm:$0xff] %v2692_v36  ;;  %v2697_v31 = vpop.xlane.xlu2 %738  ;;  %789 = vadd.xlane.f32.xlu1 %v788_v37  ;;  %v589_v36 = vmul.f32 %v2347_v34, %v2704_v62  ;;  %v2715_v37 = vld [vmem:[%s3379_s3 + $0x1f8] sm:$0xff] }
 0x1ba   :  { %3422 = vst [vmem:[#allocation23_spill] sm:$0xff] %v2697_v31 }
 0x1bb   :  { %v740_v46 = vsel %vm610_vm1, %v589_v36, 0.0 }
 0x1bd   :  { %1256 = vadd.xlane.f32.xlu0 %v1255_v14  ;;  %v609_v14 = vmul.f32 %v2347_v34, %v2715_v37 }
 0x1be   :  { %795 = vadd.xlane.f32.xlu2 %v794_v35  ;;  %v1201_v35 = vsel %vm610_vm1, %v1089_v54, 0.0  ;;  %v2734_v36 = vpop.permute.xlu1 %1061  ;;  %v1117_v54 = vmul.f32 %v2519_v17, %v2329_v28  ;;  %v1119_v28 = vmul.f32 %v2519_v17, %v2345_v33 }
 0x1bf   :  { %v800_v29 = vsel %vm610_vm1, %v609_v14, 0.0 }
 0x1c0   :  { %v2717_v31 = vpop.xlane.xlu0 %792  ;;  %v1285_v14 = vsel %vm610_vm1, %v1117_v54, 0.0  ;;  %v1291_v54 = vsel %vm610_vm1, %v1119_v28, 0.0 }
 0x1c1   :  { %3424 = vst [vmem:[#allocation25_spill] sm:$0xff] %v2717_v31  ;;  %v2722_v58 = vpop.xlane.xlu2 %762  ;;  %741 = vadd.xlane.f32.xlu1 %v740_v46  ;;  %v593_v31 = vmul.f32 %v2347_v34, %v2729_v7 }
 0x1c2   :  { %3425 = vst [vmem:[#allocation26_spill] sm:$0xff] %v2722_v58  ;;  %v1116_v58 = vmul.f32 %v2734_v36, %v2615_v39  ;;  %v1100_v39 = vmul.f32 %v2734_v36, %v2458_v32 }
 0x1c3   :  { %v752_v62 = vsel %vm610_vm1, %v593_v31, 0.0 }
 0x1c4   :  { %v1282_v34 = vsel %vm610_vm1, %v1116_v58, 0.0  ;;  %v867_v58 = vlaneseq }
 0x1c5   :  { %1202 = vadd.xlane.f32.xlu0 %v1201_v35  ;;  %v1115_v35 = vmul.f32 %v2519_v17, %v2370_v48  ;;  %v1099_v48 = vmul.f32 %v2519_v17, %v2317_v20  ;;  %v1081_v20 = vmul.f32 %v2519_v17, %v2253_v51 }
 0x1c6   :  { %801 = vadd.xlane.f32.xlu2 %v800_v29 }
 0x1c7   :  { %v1279_v31 = vsel %vm610_vm1, %v1115_v35, 0.0  ;;  %v1231_v32 = vsel %vm610_vm1, %v1099_v48, 0.0  ;;  %v1121_v48 = vmul.f32 %v2519_v17, %v2258_v52  ;;  %v1177_v51 = vsel %vm610_vm1, %v1081_v20, 0.0 }
 0x1c8   :  { %v2737_v46 = vpop.xlane.xlu0 %798  ;;  %v1104_v20 = vmul.f32 %v2734_v36, %v2542_v16 }
 0x1c9   :  { %3426 = vst [vmem:[#allocation27_spill] sm:$0xff] %v2737_v46  ;;  %v2742_v21 = vpop.xlane.xlu2 %786  ;;  %753 = vadd.xlane.f32.xlu1 %v752_v62  ;;  %v1234_v62 = vsel %vm610_vm1, %v1100_v39, 0.0 }
 0x1ca   :  { %v1246_v16 = vsel %vm610_vm1, %v1104_v20, 0.0 }
 0x1cd   :  { %1283 = vadd.xlane.f32.xlu0 %v1282_v34  ;;  %v2761_v34 = vand.u32 127, %v867_v58 }
 0x1ce   :  { %1286 = vadd.xlane.f32.xlu2 %v1285_v14  ;;  %v1122_v14 = vmul.f32 %v2734_v36, %v2484_v47 }
 0x1cf   :  { %v2769_v33 = vadd.s32 4294967288, %v2761_v34  ;;  %v874_v28 = vperm.slane %v2419_v15, %v2761_v34  ;;  %v869_v47 = vperm.slane %v2491_v53, %v2761_v34 }
 0x1d0   :  { %v664_v29 = vpop.xlane.xlu0 %663 }
 0x1d1   :  { %v2753_v46 = vpop.xlane.xlu2 %750  ;;  %1280 = vadd.xlane.f32.xlu1 %v1279_v31  ;;  %v896_v52 = vperm.slane %v664_v29, %v2769_v33  ;;  %v1103_v29 = vmul.f32 %v2519_v17, %v2334_v30 }
 0x1d5   :  { %1235 = vadd.xlane.f32.xlu0 %v1234_v62  ;;  %v1300_v62 = vsel %vm610_vm1, %v1122_v14, 0.0  ;;  %v1123_v14 = vmul.f32 %v2519_v17, %v2386_v45 }
 0x1d6   :  { %1292 = vadd.xlane.f32.xlu2 %v1291_v54 }
 0x1d8   :  { %v2763_v35 = vpop.xlane.xlu0 %681 }
 0x1d9   :  { %v622_v31 = vpop.xlane.xlu2 %621  ;;  %1232 = vadd.xlane.f32.xlu1 %v1231_v32 }
 0x1da   :  { %v875_v39 = vperm.slane %v622_v31, %v2769_v33 }
 0x1dc   :  { %v616_v58 = vpop.xlane.xlu1 %615  ;;  %v876_v32 = vsel %vm872_vm3, %v875_v39, %v874_v28  ;;  %v898_v39 = vperm.slane %v2524_v26, %v2761_v34  ;;  %v895_v28 = vperm.slane %v2574_v41, %v2761_v34  ;;  %v877_v26 = vperm.slane %v2544_v44, %v2761_v34 }
 0x1dd   :  { %v871_v54 = vperm.slane %v616_v58, %v2769_v33  ;;  %1301 = vadd.xlane.f32.xlu0 %v1300_v62  ;;  %v1297_v58 = vsel %vm610_vm1, %v1121_v48, 0.0  ;;  %v922_v44 = vperm.slane %v2649_v19, %v2761_v34 }
 0x1de   :  { %1178 = vadd.xlane.f32.xlu2 %v1177_v51  ;;  %v1303_v51 = vsel %vm610_vm1, %v1123_v14, 0.0  ;;  %v1106_v14 = vmul.f32 %v2734_v36, %v2567_v24 }
 0x1df   :  { %v873_v15 = vsel %vm872_vm3, %v871_v54, %v869_v47  ;;  %v897_v47 = vsel %vm872_vm3, %v896_v52, %v895_v28  ;;  %v907_v28 = vperm.slane %v2558_v4, %v2761_v34 }
 0x1e0   :  { %v968_v31 = vsel %vm967_vm2, %v876_v32, %v873_v15  ;;  %v2789_v53 = vpop.xlane.xlu0 %699  ;;  %v1252_v19 = vsel %vm610_vm1, %v1106_v14, 0.0 }
 0x1e1   :  { %v670_v62 = vpop.xlane.xlu2 %669  ;;  %1298 = vadd.xlane.f32.xlu1 %v1297_v58  ;;  %v1243_v58 = vsel %vm610_vm1, %v1103_v29, 0.0 }
 0x1e2   :  { %v899_v45 = vperm.slane %v670_v62, %v2769_v33 }
 0x1e4   :  { %v900_v48 = vsel %vm872_vm3, %v899_v45, %v898_v39  ;;  %v628_v54 = vpop.xlane.xlu1 %627  ;;  %v1125_v39 = vmul.f32 %v2519_v17, %v2365_v40  ;;  %v880_v40 = vperm.slane %v2442_v25, %v2761_v34  ;;  %v955_v25 = vperm.slane %v2681_v50, %v2761_v34 }
 0x1e5   :  { %v2808_v32 = vsel %vm967_vm2, %v900_v48, %v897_v47  ;;  %v878_v41 = vperm.slane %v628_v54, %v2769_v33  ;;  %1247 = vadd.xlane.f32.xlu0 %v1246_v16  ;;  %v1105_v47 = vmul.f32 %v2519_v17, %v2312_v18  ;;  %v1068_v18 = vmul.f32 %v2734_v36, %v2415_v1 }
 0x1e6   :  { %1304 = vadd.xlane.f32.xlu2 %v1303_v51  ;;  %v1309_v48 = vsel %vm610_vm1, %v1125_v39, 0.0  ;;  %v1067_v50 = vmul.f32 %v2519_v17, %v2158_v13 }
 0x1e7   :  { %v879_v30 = vsel %vm872_vm3, %v878_v41, %v877_v26  ;;  %v1249_v26 = vsel %vm610_vm1, %v1105_v47, 0.0  ;;  %v1138_v1 = vsel %vm610_vm1, %v1068_v18, 0.0 }
 0x1e8   :  { %v970_v15 = vsel %vm969_vm4, %v879_v30, %v968_v31  ;;  %v718_v52 = vpop.xlane.xlu0 %717  ;;  %v1135_v13 = vsel %vm610_vm1, %v1067_v50, 0.0 }
 0x1e9   :  { %v923_v20 = vperm.slane %v718_v52, %v2769_v33  ;;  %v688_v62 = vpop.xlane.xlu2 %687  ;;  %1244 = vadd.xlane.f32.xlu1 %v1243_v58  ;;  %v1087_v52 = vmul.f32 %v2519_v17, %v2277_v60  ;;  %v916_v58 = vperm.slane %v2586_v22, %v2761_v34  ;;  %v883_v60 = vperm.slane %v2468_v0, %v2761_v34 }
 0x1ea   :  { %v908_v31 = vperm.slane %v688_v62, %v2769_v33  ;;  %v937_v0 = vperm.slane %v2709_v63, %v2761_v34 }
 0x1eb   :  { %v2825_v45 = vsel %vm872_vm3, %v923_v20, %v922_v44  ;;  %v1195_v62 = vsel %vm610_vm1, %v1087_v52, 0.0 }
 0x1ec   :  { %v2828_v24 = vsel %vm872_vm3, %v908_v31, %v907_v28  ;;  %v634_v29 = vpop.xlane.xlu1 %633 }
 0x1ed   :  { %v881_v4 = vperm.slane %v634_v29, %v2769_v33  ;;  %1253 = vadd.xlane.f32.xlu0 %v1252_v19  ;;  %v1128_v29 = vmul.f32 %v2734_v36, %v2715_v37 }
 0x1ee   :  { %1310 = vadd.xlane.f32.xlu2 %v1309_v48 }
 0x1ef   :  { %v882_v54 = vsel %vm872_vm3, %v881_v4, %v880_v40  ;;  %v1069_v40 = vmul.f32 %v2519_v17, %v2227_v42  ;;  %v925_v4 = vperm.slane %v2617_v3, %v2761_v34  ;;  %v1318_v63 = vsel %vm610_vm1, %v1128_v29, 0.0 }
 0x1f0   :  { %v972_v16 = vsel %vm971_vm5, %v882_v54, %v970_v15  ;;  %v784_v51 = vpop.xlane.xlu0 %783  ;;  %v886_v42 = vperm.slane %v2496_v57, %v2761_v34  ;;  %v1114_v57 = vmul.f32 %v2734_v36, %v2592_v43 }
 0x1f1   :  { %v956_v41 = vperm.slane %v784_v51, %v2769_v33  ;;  %v706_v30 = vpop.xlane.xlu2 %705  ;;  %1250 = vadd.xlane.f32.xlu1 %v1249_v26  ;;  %v1127_v51 = vmul.f32 %v2519_v17, %v2381_v2  ;;  %v1141_v3 = vsel %vm610_vm1, %v1069_v40, 0.0  ;;  %v892_v40 = vperm.slane %v2549_v56, %v2761_v34 }
 0x1f2   :  { %v917_v15 = vperm.slane %v706_v30, %v2769_v33  ;;  %v1110_v30 = vmul.f32 %v2734_v36, %v2512_v10  ;;  %v1109_v10 = vmul.f32 %v2519_v17, %v2282_v61  ;;  %v1276_v43 = vsel %vm610_vm1, %v1114_v57, 0.0 }
 0x1f3   :  { %v2851_v14 = vsel %vm872_vm3, %v956_v41, %v955_v25  ;;  %v1315_v41 = vsel %vm610_vm1, %v1127_v51, 0.0  ;;  %v1102_v51 = vmul.f32 %v2734_v36, %v2517_v11 }
 0x1f4   :  { %v640_v44 = vpop.xlane.xlu1 %639  ;;  %v2857_v20 = vsel %vm872_vm3, %v917_v15, %v916_v58  ;;  %v928_v58 = vperm.slane %v2672_v6, %v2761_v34  ;;  %v1264_v50 = vsel %vm610_vm1, %v1110_v30, 0.0  ;;  %v1120_v30 = vmul.f32 %v2734_v36, %v2665_v55 }
 0x1f5   :  { %v884_v22 = vperm.slane %v640_v44, %v2769_v33  ;;  %1139 = vadd.xlane.f32.xlu0 %v1138_v1 }
 0x1f6   :  { %1196 = vadd.xlane.f32.xlu2 %v1195_v62 }
 0x1f7   :  { %v885_v39 = vsel %vm872_vm3, %v884_v22, %v883_v60  ;;  %v889_v60 = vperm.slane %v2526_v12, %v2761_v34  ;;  %v1098_v12 = vmul.f32 %v2734_v36, %v2656_v9 }
 0x1f8   :  { %v974_v28 = vsel %vm973_vm6, %v885_v39, %v972_v16  ;;  %v748_v31 = vpop.xlane.xlu0 %747  ;;  %v1261_v39 = vsel %vm610_vm1, %v1109_v10, 0.0 }
 0x1f9   :  { %v938_v19 = vperm.slane %v748_v31, %v2769_v33  ;;  %v724_v47 = vpop.xlane.xlu2 %723  ;;  %1136 = vadd.xlane.f32.xlu1 %v1135_v13  ;;  %v931_v13 = vperm.slane %v2642_v27, %v2761_v34  ;;  %v1228_v9 = vsel %vm610_vm1, %v1098_v12, 0.0  ;;  %v3430_v12 = vld [vmem:[#allocation14_spill] sm:$0xff] }
 0x1fa   :  { %v926_v48 = vperm.slane %v724_v47, %v2769_v33 }
 0x1fb   :  { %v2877_v54 = vsel %vm872_vm3, %v938_v19, %v937_v0 }
 0x1fc   :  { %v2880_v37 = vsel %vm872_vm3, %v926_v48, %v925_v4  ;;  %v646_v16 = vpop.xlane.xlu1 %645 }
 0x1fd   :  { %v887_v26 = vperm.slane %v646_v16, %v2769_v33  ;;  %1319 = vadd.xlane.f32.xlu0 %v1318_v63  ;;  %v1112_v63 = vmul.f32 %v2734_v36, %v2729_v7 }
 0x1fe   :  { %1142 = vadd.xlane.f32.xlu2 %v1141_v3  ;;  %v905_v3 = vperm.slane %v2763_v35, %v2769_v33 }
 0x1ff   :  { %v888_v18 = vsel %vm872_vm3, %v887_v26, %v886_v42  ;;  %v943_v42 = vperm.slane %v2647_v38, %v2761_v34  ;;  %v1270_v7 = vsel %vm610_vm1, %v1112_v63, 0.0  ;;  %v1240_v38 = vsel %vm610_vm1, %v1102_v51, 0.0  ;;  %v3433_v51 = vld [vmem:[#allocation15_spill] sm:$0xff] }
 0x200   :  { %v2890_v25 = vpop.xlane.xlu0 %1274  ;;  %v976_v2 = vsel %vm975_vm7, %v888_v18, %v974_v28  ;;  %v1091_v28 = vmul.f32 %v2519_v17, %v2272_v59  ;;  %v1118_v59 = vmul.f32 %v2734_v36, %v2640_v23 }
 0x201   :  { %v730_v52 = vpop.xlane.xlu2 %729  ;;  %1316 = vadd.xlane.f32.xlu1 %v1315_v41 }
 0x202   :  { %v929_v15 = vperm.slane %v730_v52, %v2769_v33  ;;  %v1207_v47 = vsel %vm610_vm1, %v1091_v28, 0.0  ;;  %v1288_v16 = vsel %vm610_vm1, %v1118_v59, 0.0  ;;  %v904_v52 = vperm.slane %v2599_v49, %v2761_v34  ;;  %v3427_v49 = vld [vmem:[#allocation5_spill] sm:$0xff] }
 0x203   :  { %v1084_v10 = vmul.f32 %v2734_v36, %v3427_v49 }
 0x204   :  { %v2902_v44 = vsel %vm872_vm3, %v929_v15, %v928_v58  ;;  %v652_v1 = vpop.xlane.xlu1 %651  ;;  %v906_v57 = vsel %vm872_vm3, %v905_v3, %v904_v52  ;;  %v1093_v15 = vmul.f32 %v2519_v17, %v2301_v8  ;;  %v3434_v3 = vld [vmem:[#allocation19_spill] sm:$0xff] }
 0x205   :  { %v890_v22 = vperm.slane %v652_v1, %v2769_v33  ;;  %1265 = vadd.xlane.f32.xlu0 %v1264_v50 }
 0x206   :  { %1277 = vadd.xlane.f32.xlu2 %v1276_v43  ;;  %v1213_v28 = vsel %vm610_vm1, %v1093_v15, 0.0 }
 0x207   :  { %v891_v6 = vsel %vm872_vm3, %v890_v22, %v889_v60  ;;  %v3428_v60 = vld [vmem:[#allocation26_spill] sm:$0xff] }
 0x208   :  { %v2912_v62 = vpop.xlane.xlu0 %1226  ;;  %v978_v61 = vsel %vm977_vm8, %v891_v6, %v976_v2  ;;  %v901_v2 = vperm.slane %v2569_v5, %v2761_v34  ;;  %v1294_v5 = vsel %vm610_vm1, %v1120_v30, 0.0  ;;  %v946_v22 = vperm.slane %v3428_v60, %v2761_v34 }
 0x209   :  { %v736_v31 = vpop.xlane.xlu2 %735  ;;  %1262 = vadd.xlane.f32.xlu1 %v1261_v39  ;;  %v914_v6 = vperm.slane %v2789_v53, %v2769_v33  ;;  %v3431_v53 = vld [vmem:[#allocation17_spill] sm:$0xff] }
 0x20a   :  { %v932_v29 = vperm.slane %v736_v31, %v2769_v33 }
 0x20c   :  { %v2924_v0 = vsel %vm872_vm3, %v932_v29, %v931_v13  ;;  %v658_v19 = vpop.xlane.xlu1 %657  ;;  %v910_v13 = vperm.slane %v3430_v12, %v2761_v34 }
 0x20d   :  { %v893_v4 = vperm.slane %v658_v19, %v2769_v33  ;;  %1208 = vadd.xlane.f32.xlu0 %v1207_v47  ;;  %v913_v47 = vperm.slane %v3431_v53, %v2761_v34 }
 0x20e   :  { %1229 = vadd.xlane.f32.xlu2 %v1228_v9 }
 0x20f   :  { %v894_v27 = vsel %vm872_vm3, %v893_v4, %v892_v40  ;;  %v915_v40 = vsel %vm872_vm3, %v914_v6, %v913_v47 }
 0x210   :  { %v2934_v48 = vpop.xlane.xlu0 %1238  ;;  %v2940_v23 = vsel %vm979_vm9, %v894_v27, %v978_v61  ;;  %v3429_v61 = vld [vmem:[#allocation2_spill] sm:$0xff]  ;;  %v3432_v27 = vld [vmem:[#allocation11_spill] sm:$0xff] }
 0x211   :  { %v760_v56 = vpop.xlane.xlu2 %759  ;;  %1289 = vadd.xlane.f32.xlu1 %v1288_v16  ;;  %v1082_v31 = vmul.f32 %v2734_v36, %v3429_v61  ;;  %v1076_v16 = vmul.f32 %v2734_v36, %v3432_v27 }
 0x212   :  { %v944_v26 = vperm.slane %v760_v56, %v2769_v33 }
 0x213   :  { %v1180_v9 = vsel %vm610_vm1, %v1082_v31, 0.0 }
 0x214   :  { %v945_v18 = vsel %vm872_vm3, %v944_v26, %v943_v42  ;;  %v676_v41 = vpop.xlane.xlu1 %675  ;;  %v1086_v42 = vmul.f32 %v2734_v36, %v3433_v51  ;;  %v3442_v51 = vld [vmem:[#allocation25_spill] sm:$0xff] }
 0x215   :  { %v902_v11 = vperm.slane %v676_v41, %v2769_v33  ;;  %1271 = vadd.xlane.f32.xlu0 %v1270_v7 }
 0x216   :  { %1241 = vadd.xlane.f32.xlu2 %v1240_v38  ;;  %v3435_v38 = vld [vmem:[#allocation20_spill] sm:$0xff]  ;;  %v1192_v15 = vsel %vm610_vm1, %v1086_v42, 0.0  ;;  %v961_v42 = vperm.slane %v3442_v51, %v2761_v34 }
 0x217   :  { %v903_v35 = vsel %vm872_vm3, %v902_v11, %v901_v2  ;;  %v1162_v11 = vsel %vm610_vm1, %v1076_v16, 0.0  ;;  %v1124_v52 = vmul.f32 %v2734_v36, %v3435_v38 }
 0x218   :  { %v982_v58 = vsel %vm969_vm4, %v903_v35, %v2808_v32  ;;  %v2963_v55 = vpop.xlane.xlu0 %1184  ;;  %v3436_v35 = vld [vmem:[#allocation16_spill] sm:$0xff] }
 0x219   :  { %v983_v1 = vsel %vm971_vm5, %v906_v57, %v982_v58  ;;  %v766_v50 = vpop.xlane.xlu2 %765  ;;  %1295 = vadd.xlane.f32.xlu1 %v1294_v5  ;;  %v919_v57 = vperm.slane %v3436_v35, %v2761_v34  ;;  %v1306_v49 = vsel %vm610_vm1, %v1124_v52, 0.0 }
 0x21a   :  { %v947_v43 = vperm.slane %v766_v50, %v2769_v33  ;;  %v984_v32 = vsel %vm973_vm6, %v2828_v24, %v983_v1  ;;  %v1186_v24 = vsel %vm610_vm1, %v1084_v10, 0.0  ;;  %v1602_v10 = vld [vmem:[%s3379_s3 + $0x60] sm:$0xff] }
 0x21b   :  { %v1077_v60 = vmul.f32 %v1602_v10, %v2519_v17 }
 0x21c   :  { %v948_v8 = vsel %vm872_vm3, %v947_v43, %v946_v22  ;;  %v694_v39 = vpop.xlane.xlu1 %693 }
 0x21d   :  { %v995_v29 = vsel %vm967_vm2, %v948_v8, %v945_v18  ;;  %v911_v19 = vperm.slane %v694_v39, %v2769_v33  ;;  %1214 = vadd.xlane.f32.xlu0 %v1213_v28  ;;  %v949_v18 = vperm.slane %v3434_v3, %v2761_v34 }
 0x21e   :  { %1187 = vadd.xlane.f32.xlu2 %v1186_v24 }
 0x21f   :  { %v912_v59 = vsel %vm872_vm3, %v911_v19, %v910_v13  ;;  %v3439_v13 = vld [vmem:[#allocation21_spill] sm:$0xff]  ;;  %v958_v19 = vperm.slane %v2742_v21, %v2761_v34 }
 0x220   :  { %v2991_v4 = vpop.xlane.xlu0 %1190  ;;  %v985_v63 = vsel %vm975_vm7, %v912_v59, %v984_v32  ;;  %v3437_v32 = vld [vmem:[#allocation4_spill] sm:$0xff] }
 0x221   :  { %v772_v56 = vpop.xlane.xlu2 %771  ;;  %1181 = vadd.xlane.f32.xlu1 %v1180_v9  ;;  %v986_v26 = vsel %vm977_vm8, %v915_v40, %v985_v63  ;;  %v1066_v6 = vmul.f32 %v2734_v36, %v3437_v32  ;;  %v3440_v9 = vld [vmem:[#allocation13_spill] sm:$0xff]  ;;  %v3441_v63 = vld [vmem:[#allocation24_spill] sm:$0xff] }
 0x222   :  { %v950_v41 = vperm.slane %v772_v56, %v2769_v33  ;;  %v3005_v7 = vsel %vm979_vm9, %v2857_v20, %v986_v26  ;;  %v1080_v21 = vmul.f32 %v2734_v36, %v3440_v9  ;;  %v1108_v56 = vmul.f32 %v2734_v36, %v3441_v63  ;;  %v1604_v63 = vld [vmem:[%s3379_s3 + $0x170] sm:$0xff] }
 0x224   :  { %v951_v30 = vsel %vm872_vm3, %v950_v41, %v949_v18  ;;  %v712_v2 = vpop.xlane.xlu1 %711  ;;  %v1174_v18 = vsel %vm610_vm1, %v1080_v21, 0.0  ;;  %v3443_v41 = vld [vmem:[#allocation3_spill] sm:$0xff]  ;;  %v1258_v52 = vsel %vm610_vm1, %v1108_v56, 0.0  ;;  %v3449_v21 = vld [vmem:[#allocation18_spill] sm:$0xff]  ;;  %v1111_v56 = vmul.f32 %v1604_v63, %v2519_v17 }
 0x225   :  { %v996_v58 = vsel %vm969_vm4, %v951_v30, %v995_v29  ;;  %v920_v5 = vperm.slane %v712_v2, %v2769_v33  ;;  %1163 = vadd.xlane.f32.xlu0 %v1162_v11  ;;  %v1126_v29 = vmul.f32 %v2734_v36, %v3439_v13  ;;  %v1088_v30 = vmul.f32 %v2734_v36, %v3443_v41  ;;  %v3444_v2 = vld [vmem:[#allocation23_spill] sm:$0xff] }
 0x226   :  { %1193 = vadd.xlane.f32.xlu2 %v1192_v15  ;;  %v934_v11 = vperm.slane %v3444_v2, %v2761_v34 }
 0x227   :  { %v921_v20 = vsel %vm872_vm3, %v920_v5, %v919_v57  ;;  %v1312_v40 = vsel %vm610_vm1, %v1126_v29, 0.0  ;;  %v1198_v5 = vsel %vm610_vm1, %v1088_v30, 0.0  ;;  %v1605_v30 = vld [vmem:[%s3379_s3 + $0x40] sm:$0xff] }
 0x228   :  { %v988_v1 = vsel %vm967_vm2, %v2825_v45, %v921_v20  ;;  %v3019_v50 = vpop.xlane.xlu0 %1130  ;;  %v3438_v45 = vld [vmem:[#allocation22_spill] sm:$0xff]  ;;  %v1073_v2 = vmul.f32 %v1605_v30, %v2519_v17 }
 0x229   :  { %v989_v22 = vsel %vm969_vm4, %v2880_v37, %v988_v1  ;;  %v778_v43 = vpop.xlane.xlu2 %777  ;;  %1307 = vadd.xlane.f32.xlu1 %v1306_v49  ;;  %v952_v8 = vperm.slane %v3438_v45, %v2761_v34  ;;  %v1165_v37 = vsel %vm610_vm1, %v1077_v60, 0.0  ;;  %v3445_v1 = vld [vmem:[#allocation7_spill] sm:$0xff]  ;;  %v3447_v45 = vld [vmem:[#allocation6_spill] sm:$0xff] }
 0x22a   :  { %v953_v39 = vperm.slane %v778_v43, %v2769_v33  ;;  %v990_v28 = vsel %vm971_vm5, %v2902_v44, %v989_v22  ;;  %v1132_v44 = vsel %vm610_vm1, %v1066_v6, 0.0  ;;  %v1090_v49 = vmul.f32 %v2734_v36, %v3445_v1  ;;  %v3446_v60 = vld [vmem:[#allocation27_spill] sm:$0xff] }
 0x22b   :  { %v991_v61 = vsel %vm973_vm6, %v2924_v0, %v990_v28  ;;  %v964_v22 = vperm.slane %v3446_v60, %v2761_v34  ;;  %v1010_v6 = vsel %vm1006_vm10, %v3005_v7, 0.0  ;;  %v940_v28 = vperm.slane %v2753_v46, %v2761_v34  ;;  %v1603_v46 = vld [vmem:[%s3379_s3 + $0x30] sm:$0xff] }
 0x22c   :  { %v954_v31 = vsel %vm872_vm3, %v953_v39, %v952_v8  ;;  %v790_v12 = vpop.xlane.xlu1 %789  ;;  %v1070_v8 = vmul.f32 %v2734_v36, %v3447_v45  ;;  %v1608_v45 = vld [vmem:[%s3379_s3 + $0xf0] sm:$0xff] }
 0x22d   :  { %v997_v24 = vsel %vm971_vm5, %v954_v31, %v996_v58  ;;  %v959_v53 = vperm.slane %v790_v12, %v2769_v33  ;;  %1166 = vadd.xlane.f32.xlu0 %v1165_v37 }
 0x22e   :  { %1133 = vadd.xlane.f32.xlu2 %v1132_v44  ;;  %v998_v0 = vsel %vm973_vm6, %v2851_v14, %v997_v24  ;;  %v1144_v37 = vsel %vm610_vm1, %v1070_v8, 0.0  ;;  %v1095_v8 = vmul.f32 %v1608_v45, %v2519_v17  ;;  %v1439_v45 = vperm.slane %v2934_v48, %v2761_v34 }
 0x22f   :  { %v960_v47 = vsel %vm872_vm3, %v959_v53, %v958_v19  ;;  %v1071_v19 = vmul.f32 %v1603_v46, %v2519_v17  ;;  %v3448_v53 = vld [vmem:[#allocation8_spill] sm:$0xff] }
 0x230   :  { %v3049_v59 = vpop.xlane.xlu0 %1256  ;;  %v999_v27 = vsel %vm975_vm7, %v960_v47, %v998_v0  ;;  %v1072_v44 = vmul.f32 %v2734_v36, %v3448_v53  ;;  %v3452_v46 = vld [vmem:[#allocation12_spill] sm:$0xff] }
 0x231   :  { %v796_v16 = vpop.xlane.xlu2 %795  ;;  %1313 = vadd.xlane.f32.xlu1 %v1312_v40  ;;  %v1147_v0 = vsel %vm610_vm1, %v1071_v19, 0.0  ;;  %v1078_v19 = vmul.f32 %v2734_v36, %v3452_v46 }
 0x232   :  { %v962_v14 = vperm.slane %v796_v16, %v2769_v33  ;;  %v1150_v40 = vsel %vm610_vm1, %v1072_v44, 0.0 }
 0x234   :  { %v963_v26 = vsel %vm872_vm3, %v962_v14, %v961_v42  ;;  %v742_v3 = vpop.xlane.xlu1 %741 }
 0x235   :  { %v935_v38 = vperm.slane %v742_v3, %v2769_v33  ;;  %1175 = vadd.xlane.f32.xlu0 %v1174_v18  ;;  %v1000_v35 = vsel %vm977_vm8, %v963_v26, %v999_v27  ;;  %v1092_v27 = vmul.f32 %v2734_v36, %v3449_v21  ;;  %v1267_v18 = vsel %vm610_vm1, %v1111_v56, 0.0 }
 0x236   :  { %1259 = vadd.xlane.f32.xlu2 %v1258_v52 }
 0x237   :  { %v936_v57 = vsel %vm872_vm3, %v935_v38, %v934_v11  ;;  %v1210_v14 = vsel %vm610_vm1, %v1092_v27, 0.0  ;;  %v3450_v38 = vld [vmem:[#allocation10_spill] sm:$0xff]  ;;  %v1168_v27 = vsel %vm610_vm1, %v1078_v19, 0.0 }
 0x238   :  { %v3070_v58 = vpop.xlane.xlu0 %1202  ;;  %v992_v15 = vsel %vm975_vm7, %v936_v57, %v991_v61  ;;  %v1204_v61 = vsel %vm610_vm1, %v1090_v49, 0.0  ;;  %v1074_v52 = vmul.f32 %v2734_v36, %v3450_v38 }
 0x239   :  { %v802_v20 = vpop.xlane.xlu2 %801  ;;  %1199 = vadd.xlane.f32.xlu1 %v1198_v5  ;;  %v993_v10 = vsel %vm977_vm8, %v2877_v54, %v992_v15 }
 0x23a   :  { %v965_v43 = vperm.slane %v802_v20, %v2769_v33  ;;  %v1156_v5 = vsel %vm610_vm1, %v1074_v52, 0.0  ;;  %v1606_v20 = vld [vmem:[%s3379_s3 + $0xe8] sm:$0xff] }
 0x23b   :  { %v1094_v1 = vmul.f32 %v1606_v20, %v2734_v36 }
 0x23c   :  { %v754_v32 = vpop.xlane.xlu1 %753  ;;  %v966_v39 = vsel %vm872_vm3, %v965_v43, %v964_v22 }
 0x23d   :  { %v941_v54 = vperm.slane %v754_v32, %v2769_v33  ;;  %1011 = vadd.xlane.f32.xlu0 %v1010_v6  ;;  %v3091_v31 = vsel %vm979_vm9, %v966_v39, %v1000_v35  ;;  %v1153_v35 = vsel %vm610_vm1, %v1073_v2, 0.0  ;;  %v1216_v22 = vsel %vm610_vm1, %v1094_v1, 0.0 }
 0x23e   :  { %1205 = vadd.xlane.f32.xlu2 %v1204_v61  ;;  %v1219_v61 = vsel %vm610_vm1, %v1095_v8, 0.0 }
 0x23f   :  { %v942_v12 = vsel %vm872_vm3, %v941_v54, %v940_v28  ;;  %v3451_v28 = vld [vmem:[#allocation9_spill] sm:$0xff] }
 0x240   :  { %v3094_v7 = vpop.xlane.xlu0 %1283  ;;  %v3098_v13 = vsel %vm979_vm9, %v942_v12, %v993_v10  ;;  %v1607_v10 = vld [vmem:[%s3379_s3 + $0x50] sm:$0xff]  ;;  %v1096_v54 = vmul.f32 %v2734_v36, %v3451_v28 }
 0x241   :  { %v3100_v29 = vpop.xlane.xlu2 %1286  ;;  %1145 = vadd.xlane.f32.xlu1 %v1144_v37  ;;  %v1075_v60 = vmul.f32 %v1607_v10, %v2519_v17  ;;  %v1461_v30 = vperm.slane %v3094_v7, %v2769_v33 }
 0x242   :  { %v1222_v12 = vsel %vm610_vm1, %v1096_v54, 0.0  ;;  %v1463_v1 = vperm.slane %v3100_v29, %v2761_v34 }
 0x243   :  { %v1159_v32 = vsel %vm610_vm1, %v1075_v60, 0.0 }
 0x244   :  { %v3106_v24 = vpop.xlane.xlu1 %1280 }
 0x246   :  { %1148 = vadd.xlane.f32.xlu2 %v1147_v0  ;;  %v1609_v0 = vld [vmem:[%s3379_s3 + $0x70] sm:$0xff] }
 0x248   :  { %v1236_v47 = vpop.xlane.xlu0 %1235 }
 0x249   :  { %v3112_v9 = vpop.xlane.xlu2 %1292  ;;  %1151 = vadd.xlane.f32.xlu1 %v1150_v40  ;;  %v1437_v51 = vperm.slane %v1236_v47, %v2769_v33  ;;  %v1079_v47 = vmul.f32 %v1609_v0, %v2519_v17  ;;  %v1016_v17 = vsel %vm1006_vm10, %v3091_v31, 0.0 }
 0x24a   :  { %v1466_v48 = vperm.slane %v3112_v9, %v2761_v34 }
 0x24b   :  { %v1171_v36 = vsel %vm610_vm1, %v1079_v47, 0.0 }
 0x24c   :  { %v1233_v16 = vpop.xlane.xlu1 %1232 }
 0x24d   :  { %v1436_v42 = vperm.slane %v1233_v16, %v2761_v34 }
 0x24e   :  { %1211 = vadd.xlane.f32.xlu2 %v1210_v14 }
 0x24f   :  { %v3124_v26 = vsel %vm872_vm3, %v1437_v51, %v1436_v42  ;;  %v1460_v51 = vperm.slane %v3106_v24, %v2761_v34  ;;  %v1013_v42 = vsel %vm1006_vm10, %v3098_v13, 0.0  ;;  %v1007_v13 = vsel %vm1006_vm10, %v2940_v23, 0.0 }
 0x250   :  { %v3126_v3 = vpop.xlane.xlu0 %1301 }
 0x251   :  { %v3129_v41 = vpop.xlane.xlu2 %1178  ;;  %1268 = vadd.xlane.f32.xlu1 %v1267_v18  ;;  %v1457_v18 = vperm.slane %v2890_v25, %v2761_v34  ;;  %v1462_v38 = vsel %vm872_vm3, %v1461_v30, %v1460_v51  ;;  %v1433_v25 = vperm.slane %v2912_v62, %v2761_v34 }
 0x254   :  { %v3135_v11 = vpop.xlane.xlu1 %1298 }
 0x255   :  { %v1469_v28 = vperm.slane %v3135_v11, %v2761_v34 }
 0x256   :  { %1154 = vadd.xlane.f32.xlu2 %v1153_v35 }
 0x258   :  { %v3140_v57 = vpop.xlane.xlu0 %1247 }
 0x259   :  { %v3143_v15 = vpop.xlane.xlu2 %1304  ;;  %1157 = vadd.xlane.f32.xlu1 %v1156_v5 }
 0x25c   :  { %v3149_v49 = vpop.xlane.xlu1 %1244 }
 0x25d   :  { %v1442_v62 = vperm.slane %v3149_v49, %v2761_v34 }
 0x25e   :  { %1217 = vadd.xlane.f32.xlu2 %v1216_v22 }
 0x260   :  { %v3156_v43 = vpop.xlane.xlu0 %1253 }
 0x261   :  { %v3159_v6 = vpop.xlane.xlu2 %1310  ;;  %1160 = vadd.xlane.f32.xlu1 %v1159_v32  ;;  %v1446_v54 = vperm.slane %v3156_v43, %v2769_v33 }
 0x264   :  { %v3165_v39 = vpop.xlane.xlu1 %1250 }
 0x265   :  { %v1445_v8 = vperm.slane %v3165_v39, %v2761_v34 }
 0x266   :  { %1220 = vadd.xlane.f32.xlu2 %v1219_v61 }
 0x267   :  { %v1447_v11 = vsel %vm872_vm3, %v1446_v54, %v1445_v8 }
 0x268   :  { %v1140_v53 = vpop.xlane.xlu0 %1139 }
 0x269   :  { %v3171_v37 = vpop.xlane.xlu2 %1196  ;;  %1223 = vadd.xlane.f32.xlu1 %v1222_v12  ;;  %v1389_v40 = vperm.slane %v1140_v53, %v2769_v33 }
 0x26c   :  { %v1137_v44 = vpop.xlane.xlu1 %1136 }
 0x26d   :  { %v1388_v21 = vperm.slane %v1137_v44, %v2761_v34 }
 0x26e   :  { %1169 = vadd.xlane.f32.xlu2 %v1168_v27 }
 0x26f   :  { %v3183_v16 = vsel %vm872_vm3, %v1389_v40, %v1388_v21  ;;  %v1412_v40 = vperm.slane %v2963_v55, %v2761_v34 }
 0x270   :  { %v1320_v30 = vpop.xlane.xlu0 %1319 }
 0x271   :  { %v3186_v63 = vpop.xlane.xlu2 %1142  ;;  %1172 = vadd.xlane.f32.xlu1 %v1171_v36  ;;  %v1409_v36 = vperm.slane %v3129_v41, %v2761_v34 }
 0x274   :  { %v3188_v56 = vpop.xlane.xlu1 %1316 }
 0x276   :  { %1017 = vadd.xlane.f32.xlu2 %v1016_v17 }
 0x279   :  { %v1278_v14 = vpop.xlane.xlu2 %1277  ;;  %1014 = vadd.xlane.f32.xlu1 %v1013_v42 }
 0x27a   :  { %v1458_v2 = vperm.slane %v1278_v14, %v2769_v33 }
 0x27c   :  { %v1459_v31 = vsel %vm872_vm3, %v1458_v2, %v1457_v18  ;;  %v3203_v52 = vpop.xlane.xlu1 %1262  ;;  %v1415_v18 = vperm.slane %v2991_v4, %v2761_v34  ;;  %v1385_v4 = vperm.slane %v3019_v50, %v2761_v34 }
 0x27d   :  { %v1502_v24 = vsel %vm967_vm2, %v1462_v38, %v1459_v31  ;;  %v1472_v31 = vperm.slane %v3143_v15, %v2761_v34 }
 0x27e   :  { %1008 = vadd.xlane.f32.xlu2 %v1007_v13 }
 0x281   :  { %v1230_v35 = vpop.xlane.xlu2 %1229 }
 0x282   :  { %v1434_v7 = vperm.slane %v1230_v35, %v2769_v33 }
 0x284   :  { %v1435_v5 = vsel %vm872_vm3, %v1434_v7, %v1433_v25  ;;  %v1290_v20 = vpop.xlane.xlu1 %1289 }
 0x285   :  { %v1495_v10 = vsel %vm967_vm2, %v3124_v26, %v1435_v5  ;;  %v1464_v60 = vperm.slane %v1290_v20, %v2769_v33  ;;  %v1443_v26 = vperm.slane %v3140_v57, %v2769_v33  ;;  %v1470_v57 = vperm.slane %v3126_v3, %v2769_v33  ;;  %v1266_v20 = vpop.xlane.xlu0 %1265 }
 0x286   :  { %v1478_v5 = vperm.slane %v3188_v56, %v2761_v34 }
 0x287   :  { %v1465_v23 = vsel %vm872_vm3, %v1464_v60, %v1463_v1  ;;  %v1444_v12 = vsel %vm872_vm3, %v1443_v26, %v1442_v62  ;;  %v1471_v44 = vsel %vm872_vm3, %v1470_v57, %v1469_v28  ;;  %v1452_v26 = vperm.slane %v1266_v20, %v2769_v33 }
 0x288   :  { %v1503_v22 = vsel %vm969_vm4, %v1465_v23, %v1502_v24 }
 0x289   :  { %v1242_v32 = vpop.xlane.xlu2 %1241 }
 0x28a   :  { %v1440_v29 = vperm.slane %v1242_v32, %v2769_v33  ;;  %v1451_v32 = vperm.slane %v3203_v52, %v2761_v34 }
 0x28c   :  { %v1441_v49 = vsel %vm872_vm3, %v1440_v29, %v1439_v45  ;;  %v1296_v61 = vpop.xlane.xlu1 %1295  ;;  %v1453_v52 = vsel %vm872_vm3, %v1452_v26, %v1451_v32 }
 0x28d   :  { %v1496_v39 = vsel %vm969_vm4, %v1441_v49, %v1495_v10  ;;  %v1467_v46 = vperm.slane %v1296_v61, %v2769_v33  ;;  %v1475_v10 = vperm.slane %v3159_v6, %v2761_v34  ;;  %v1448_v6 = vperm.slane %v3049_v59, %v2761_v34  ;;  %v1209_v59 = vpop.xlane.xlu0 %1208 }
 0x28e   :  { %v1497_v19 = vsel %vm971_vm5, %v1444_v12, %v1496_v39  ;;  %v1418_v49 = vperm.slane %v3171_v37, %v2761_v34 }
 0x28f   :  { %v1468_v43 = vsel %vm872_vm3, %v1467_v46, %v1466_v48  ;;  %v1498_v53 = vsel %vm973_vm6, %v1447_v11, %v1497_v19  ;;  %v1421_v11 = vperm.slane %v3070_v58, %v2761_v34 }
 0x290   :  { %v1504_v9 = vsel %vm971_vm5, %v1468_v43, %v1503_v22  ;;  %v1479_v22 = vperm.slane %v1320_v30, %v2769_v33 }
 0x291   :  { %v1188_v0 = vpop.xlane.xlu2 %1187  ;;  %v1505_v47 = vsel %vm973_vm6, %v1471_v44, %v1504_v9  ;;  %v1391_v44 = vperm.slane %v3186_v63, %v2761_v34 }
 0x292   :  { %v1413_v3 = vperm.slane %v1188_v0, %v2769_v33  ;;  %v1480_v62 = vsel %vm872_vm3, %v1479_v22, %v1478_v5 }
 0x294   :  { %v1414_v21 = vsel %vm872_vm3, %v1413_v3, %v1412_v40  ;;  %v1182_v27 = vpop.xlane.xlu1 %1181 }
 0x295   :  { %v1410_v17 = vperm.slane %v1182_v27, %v2769_v33 }
 0x297   :  { %v1411_v51 = vsel %vm872_vm3, %v1410_v17, %v1409_v36 }
 0x298   :  { %v1488_v42 = vsel %vm967_vm2, %v1414_v21, %v1411_v51 }
 0x299   :  { %v1194_v14 = vpop.xlane.xlu2 %1193 }
 0x29a   :  { %v1416_v55 = vperm.slane %v1194_v14, %v2769_v33 }
 0x29c   :  { %v1417_v2 = vsel %vm872_vm3, %v1416_v55, %v1415_v18  ;;  %v1308_v38 = vpop.xlane.xlu1 %1307 }
 0x29d   :  { %v1489_v41 = vsel %vm969_vm4, %v1417_v2, %v1488_v42  ;;  %v1473_v24 = vperm.slane %v1308_v38, %v2769_v33 }
 0x29f   :  { %v1474_v13 = vsel %vm872_vm3, %v1473_v24, %v1472_v31 }
 0x2a0   :  { %v1506_v35 = vsel %vm975_vm7, %v1474_v13, %v1505_v47  ;;  %v1272_v47 = vpop.xlane.xlu0 %1271  ;;  %v1424_v13 = vperm.slane %v1209_v59, %v2761_v34 }
 0x2a1   :  { %v1134_v25 = vpop.xlane.xlu2 %1133  ;;  %v1455_v17 = vperm.slane %v1272_v47, %v2769_v33 }
 0x2a2   :  { %v1386_v7 = vperm.slane %v1134_v25, %v2769_v33 }
 0x2a4   :  { %v1387_v15 = vsel %vm872_vm3, %v1386_v7, %v1385_v4  ;;  %v1314_v1 = vpop.xlane.xlu1 %1313 }
 0x2a5   :  { %v1481_v60 = vsel %vm967_vm2, %v3183_v16, %v1387_v15  ;;  %v1476_v23 = vperm.slane %v1314_v1, %v2769_v33 }
 0x2a7   :  { %v1477_v50 = vsel %vm872_vm3, %v1476_v23, %v1475_v10 }
 0x2a8   :  { %v1507_v56 = vsel %vm977_vm8, %v1477_v50, %v1506_v35  ;;  %v1215_v27 = vpop.xlane.xlu0 %1214 }
 0x2a9   :  { %v1260_v45 = vpop.xlane.xlu2 %1259  ;;  %v1508_v8 = vsel %vm979_vm9, %v1480_v62, %v1507_v56  ;;  %v1427_v25 = vperm.slane %v1215_v27, %v2761_v34 }
 0x2aa   :  { %v1449_v16 = vperm.slane %v1260_v45, %v2769_v33  ;;  %v1522_v29 = vsel %vm1006_vm10, %v1508_v8, 0.0 }
 0x2ab   :  { %1523 = vadd.xlane.f32.xlu1 %v1522_v29 }
 0x2ac   :  { %v1450_v28 = vsel %vm872_vm3, %v1449_v16, %v1448_v6  ;;  %v1200_v54 = vpop.xlane.xlu1 %1199 }
 0x2ad   :  { %v1419_v61 = vperm.slane %v1200_v54, %v2769_v33  ;;  %v1499_v48 = vsel %vm975_vm7, %v1450_v28, %v1498_v53 }
 0x2ae   :  { %v1500_v12 = vsel %vm977_vm8, %v1453_v52, %v1499_v48 }
 0x2af   :  { %v1420_v39 = vsel %vm872_vm3, %v1419_v61, %v1418_v49 }
 0x2b0   :  { %v1490_v46 = vsel %vm971_vm5, %v1420_v39, %v1489_v41  ;;  %v1164_v30 = vpop.xlane.xlu0 %1163 }
 0x2b1   :  { %v1206_v57 = vpop.xlane.xlu2 %1205  ;;  %v1401_v8 = vperm.slane %v1164_v30, %v2769_v33 }
 0x2b2   :  { %v1422_v19 = vperm.slane %v1206_v57, %v2769_v33  ;;  %v1022_v57 = vld [vmem:[%s3380_s4 + $0x18] sm:$0xff] }
 0x2b4   :  { %v1423_v37 = vsel %vm872_vm3, %v1422_v19, %v1421_v11  ;;  %v1146_v43 = vpop.xlane.xlu1 %1145 }
 0x2b5   :  { %v1491_v53 = vsel %vm973_vm6, %v1423_v37, %v1490_v46  ;;  %v1392_v9 = vperm.slane %v1146_v43, %v2769_v33 }
 0x2b7   :  { %v1393_v0 = vsel %vm872_vm3, %v1392_v9, %v1391_v44  ;;  %v1021_v9 = vld [vmem:[%s3380_s4 + $0x10] sm:$0xff] }
 0x2b8   :  { %v1482_v40 = vsel %vm969_vm4, %v1393_v0, %v1481_v60  ;;  %v1167_v31 = vpop.xlane.xlu0 %1166 }
 0x2b9   :  { %v1149_v3 = vpop.xlane.xlu2 %1148  ;;  %v1403_v26 = vperm.slane %v1167_v31, %v2761_v34 }
 0x2ba   :  { %v1394_v23 = vperm.slane %v1149_v3, %v2761_v34  ;;  %v1019_v3 = vld [vmem:[%s3380_s4] sm:$0xff] }
 0x2bc   :  { %v1152_v21 = vpop.xlane.xlu1 %1151 }
 0x2bd   :  { %v1395_v20 = vperm.slane %v1152_v21, %v2769_v33 }
 0x2bf   :  { %v1396_v6 = vsel %vm872_vm3, %v1395_v20, %v1394_v23 }
 0x2c0   :  { %v1176_v56 = vpop.xlane.xlu0 %1175  ;;  %v1483_v52 = vsel %vm971_vm5, %v1396_v6, %v1482_v40 }
 0x2c1   :  { %v1212_v58 = vpop.xlane.xlu2 %1211  ;;  %v1407_v59 = vperm.slane %v1176_v56, %v2769_v33 }
 0x2c2   :  { %v1425_v41 = vperm.slane %v1212_v58, %v2769_v33 }
 0x2c4   :  { %v1269_v36 = vpop.xlane.xlu1 %1268  ;;  %v1426_v4 = vsel %vm872_vm3, %v1425_v41, %v1424_v13 }
 0x2c5   :  { %v1454_v51 = vperm.slane %v1269_v36, %v2761_v34  ;;  %v1492_v60 = vsel %vm975_vm7, %v1426_v4, %v1491_v53 }
 0x2c7   :  { %v1456_v63 = vsel %vm872_vm3, %v1455_v17, %v1454_v51 }
 0x2c8   :  { %v1501_v42 = vsel %vm979_vm9, %v1456_v63, %v1500_v12 }
 0x2c9   :  { %v1155_v14 = vpop.xlane.xlu2 %1154  ;;  %v1519_v18 = vsel %vm1006_vm10, %v1501_v42, 0.0 }
 0x2ca   :  { %1520 = vadd.xlane.f32.xlu0 %v1519_v18  ;;  %v1397_v32 = vperm.slane %v1155_v14, %v2761_v34 }
 0x2cc   :  { %v1158_v55 = vpop.xlane.xlu1 %1157 }
 0x2cd   :  { %v1398_v10 = vperm.slane %v1158_v55, %v2769_v33  ;;  %v545_v55 = vld [vmem:[%s3381_s5] sm:$0x3] }
 0x2cf   :  { %v1399_v28 = vsel %vm872_vm3, %v1398_v10, %v1397_v32 }
 0x2d0   :  { %v1484_v12 = vsel %vm973_vm6, %v1399_v28, %v1483_v52 }
 0x2d1   :  { %v1218_v2 = vpop.xlane.xlu2 %1217 }
 0x2d2   :  { %v1428_v24 = vperm.slane %v1218_v2, %v2769_v33 }
 0x2d4   :  { %v1161_v38 = vpop.xlane.xlu1 %1160  ;;  %v1429_v7 = vsel %vm872_vm3, %v1428_v24, %v1427_v25  ;;  %v1031_v25 = vld [vmem:[%s3382_s6] sm:$0x3] }
 0x2d5   :  { %v1400_v22 = vperm.slane %v1161_v38, %v2761_v34  ;;  %v1493_v62 = vsel %vm977_vm8, %v1429_v7, %v1492_v60 }
 0x2d7   :  { %v1402_v49 = vsel %vm872_vm3, %v1401_v8, %v1400_v22 }
 0x2d8   :  { %v1485_v46 = vsel %vm975_vm7, %v1402_v49, %v1484_v12 }
 0x2d9   :  { %v1221_v35 = vpop.xlane.xlu2 %1220 }
 0x2da   :  { %v1430_v15 = vperm.slane %v1221_v35, %v2761_v34 }
 0x2dc   :  { %v1224_v5 = vpop.xlane.xlu1 %1223 }
 0x2dd   :  { %v1431_v1 = vperm.slane %v1224_v5, %v2769_v33  ;;  %v1537_v5 = vld [vmem:[%s3382_s6] sm:$0x3] }
 0x2df   :  { %v1432_v50 = vsel %vm872_vm3, %v1431_v1, %v1430_v15 }
 0x2e0   :  { %v1494_v45 = vsel %vm979_vm9, %v1432_v50, %v1493_v62 }
 0x2e1   :  { %v1170_v16 = vpop.xlane.xlu2 %1169  ;;  %v1516_v29 = vsel %vm1006_vm10, %v1494_v45, 0.0 }
 0x2e2   :  { %v1404_v54 = vperm.slane %v1170_v16, %v2769_v33  ;;  %1517 = vadd.xlane.f32.xlu2 %v1516_v29  ;;  %v1020_v33 = vld [vmem:[%s3380_s4 + $0x8] sm:$0xff] }
 0x2e4   :  { %v1405_v61 = vsel %vm872_vm3, %v1404_v54, %v1403_v26  ;;  %v1173_v48 = vpop.xlane.xlu1 %1172 }
 0x2e5   :  { %v1406_v39 = vperm.slane %v1173_v48, %v2761_v34  ;;  %v1486_v19 = vsel %vm977_vm8, %v1405_v61, %v1485_v46  ;;  %v1012_v34 = vpop.xlane.xlu0 %1011 }
 0x2e6   :  { %v1024_v47 = vadd.f32 %v1020_v33, %v1012_v34 }
 0x2e7   :  { %v1408_v11 = vsel %vm872_vm3, %v1407_v59, %v1406_v39 }
 0x2e8   :  { %v1487_v37 = vsel %vm979_vm9, %v1408_v11, %v1486_v19 }
 0x2e9   :  { %v1018_v43 = vpop.xlane.xlu2 %1017  ;;  %v1513_v44 = vsel %vm1006_vm10, %v1487_v37, 0.0 }
 0x2ea   :  { %v1026_v53 = vadd.f32 %v1022_v57, %v1018_v43  ;;  %1514 = vadd.xlane.f32.xlu1 %v1513_v44 }
 0x2ec   :  { %1586 = vtanh.f32 %v1026_v53  ;;  %v1015_v0 = vpop.xlane.xlu1 %1014 }
 0x2ed   :  { %v1025_v40 = vadd.f32 %v1021_v9, %v1015_v0 }
 0x2ef   :  { %1588 = vtanh.f32 %v1025_v40 }
 0x2f0   :  { %1590 = vtanh.f32 %v1024_v47 }
 0x2f1   :  { %v1009_v21 = vpop.xlane.xlu2 %1008 }
 0x2f2   :  { %v1587_v58 = vpop.eup %1586  ;;  %v1023_v27 = vadd.f32 %v1019_v3, %v1009_v21 }
 0x2f3   :  { %1047 = vmatpush.msra.mxu3 %v1587_v58 }
 0x2f4   :  { %1592 = vtanh.f32 %v1023_v27 }
 0x2f5   :  { %v1589_v36 = vpop.eup %1588 }
 0x2f6   :  { %1048 = vmatpush.msra.mxu3 %v1589_v36  ;;  %v1591_v17 = vpop.eup %1590 }
 0x2f8   :  { %1049 = vmatpush.msra.mxu3 %v1591_v17 }
 0x2fa   :  { %v1593_v51 = vpop.eup %1592 }
 0x2fb   :  { %1050 = vmatpush.msra.mxu3 %v1593_v51 }
 0x2fc   :  { %1576 = vmatmul.msk.f32.vlgmr.msra.gmra.mxu3 %vm176_vm0, %v545_v55 }
 0x31e   :  { %v1524_v63 = vpop.xlane.xlu1 %1523 }
 0x31f   :  { %v1532_v42 = vadd.f32 %v1524_v63, %v1022_v57 }
 0x321   :  { %1594 = vtanh.f32 %v1532_v42 }
 0x327   :  { %v1595_v14 = vpop.eup %1594 }
 0x328   :  { %1550 = vmatpush.msrb.mxu3 %v1595_v14 }
 0x33d   :  { %v1521_v18 = vpop.xlane.xlu0 %1520 }
 0x33e   :  { %v1531_v30 = vadd.f32 %v1521_v18, %v1021_v9 }
 0x340   :  { %1596 = vtanh.f32 %v1531_v30 }
 0x346   :  { %v1597_v2 = vpop.eup %1596 }
 0x347   :  { %1551 = vmatpush.msrb.mxu3 %v1597_v2 }
 0x355   :  { %v1518_v38 = vpop.xlane.xlu2 %1517 }
 0x356   :  { %v1530_v31 = vadd.f32 %v1518_v38, %v1020_v33 }
 0x358   :  { %1598 = vtanh.f32 %v1530_v31 }
 0x35d   :  { %v1515_v41 = vpop.xlane.xlu1 %1514 }
 0x35e   :  { %v1599_v24 = vpop.eup %1598  ;;  %v1529_v13 = vadd.f32 %v1515_v41, %v1019_v3 }
 0x35f   :  { %1552 = vmatpush.msrb.mxu3 %v1599_v24 }
 0x360   :  { %1600 = vtanh.f32 %v1529_v13 }
 0x366   :  { %v1601_v35 = vpop.eup %1600 }
 0x367   :  { %1553 = vmatpush.msrb.mxu3 %v1601_v35 }
 0x368   :  { %1577 = vmatmul.msk.f32.vlgmr.msrb.gmra.mxu3 %vm176_vm0, %v545_v55 }
 0x37f   :  { %v1052_v4 = vpop.f32.mrf.mxu3 }
 0x380   :  { %v1053_v7 = vadd.f32 %v1052_v4, %v1031_v25 }
 0x382   :  { %1056 = vst.msk [vmem:[%s3383_s7] sm:$0x3] %vm1055_vm11, %v1053_v7 }
 0x3eb   :  { %v1555_v20 = vpop.f32.mrf.mxu3 }
 0x3ec   :  { %v1556_v15 = vadd.f32 %v1555_v20, %v1537_v5 }
 0x3ee   :  { %1559 = vrot.lane.b32.xlu0 %v1556_v15, %s1612_s24 }
 0x460   :  { %v1560_v1 = vpop.permute.xlu0 %1559 }
 0x461   :  { %1563 = vst.msk [vmem:[%s3383_s7] sm:$0x3] %vm1562_vm12, %v1560_v1 }

</bundles_post_ra>
